<compile_context>
chip_gen: v6e
topology: v6e:2x2x1
jax: 0.10.0
libtpu: 0.0.40
codegen_flags: <defaults>
</compile_context>

<pallas_src>
import jax
import jax.numpy as jnp
import numpy as np
from jax.experimental import pallas as pl
from jax.experimental.pallas import tpu as pltpu

# ----------------------------- problem sizes -------------------------------
INPUT_DIM = 136
Z_DIM = 4
H1, H2, H3 = 512, 256, 128

MAX_BATCH_TILE = 512  # large enough to amortize per-grid-step overhead; tiny in VMEM


def _round_up(n, m):
    return ((n + m - 1) // m) * m


# --------------------------- chip-aware tiling -------------------------------
def _detect_chip():
    """Return (num_tensorcores, bf16_valu).  Conservative fallbacks; wrong
    detection only affects performance, never correctness."""
    try:
        kind = jax.devices()[0].device_kind.lower()
    except Exception:
        return 1, False
    if "v6" in kind:                     # v6e: 1 TC, bf16 VPU
        return 1, True
    if "7" in kind:                      # v7x: 2 TCs, bf16 VPU
        return 2, True
    if "v5p" in kind or "v4" in kind:    # megacore, no fast bf16 VPU assumed
        return 2, False
    return 1, False                      # v5e and older: 1 TC, f32 elementwise


def _choose_batch_tile(batch, num_cores):
    """Single tile up to MAX_BATCH_TILE on 1-TC chips; on megacore chips split
    2-way only when each core gets >= 128 rows."""
    b8 = _round_up(max(batch, 1), 8)
    if num_cores >= 2 and b8 >= 256:
        per_core = _round_up(-(-b8 // 2), 8)
        return min(MAX_BATCH_TILE, per_core)
    return min(MAX_BATCH_TILE, b8)


# ------------------------------- kernel ------------------------------------
def make_vae_kernel(ew_bf16):
    """ew_bf16: run the bias-add + ReLU chain in bf16 (v6e/v7x bf16 VPU)."""
    ew_dtype = jnp.bfloat16 if ew_bf16 else jnp.float32

    def vae_kernel(
        x_ref,
        w1, b1, w2, b2, w3, b3,          # encoder
        wz, bz,                          # fused fc21 . dfc3 (mu path)
        w4, b4, w5, b5, w6, b6,          # decoder
        o_ref,
    ):
        def relu_lin(h, w, b):
            # bf16 operands on the MXU, f32 accumulation; elementwise epilogue
            # in ew_dtype (bf16 packs pairs on chips with a bf16 VPU).
            acc = jnp.dot(h.astype(jnp.bfloat16), w[...],
                          preferred_element_type=jnp.float32)
            acc = acc.astype(ew_dtype) + b[...].astype(ew_dtype)
            return jnp.maximum(acc, 0)

        x = x_ref[...]  # (tile, 136) f32; cast to bf16 happens inside relu_lin

        # ---- encoder ----
        h = relu_lin(x, w1, b1)
        h = relu_lin(h, w2, b2)
        h = relu_lin(h, w3, b3)

        # ---- fc21 (mu) fused with dfc3 (eval mode: z = mu, exact fusion) ----
        d = relu_lin(h, wz, bz)

        # ---- decoder ----
        d = relu_lin(d, w4, b4)
        d = relu_lin(d, w5, b5)

        # final layer: f32 bias add + tanh, f32 output
        out = jnp.dot(d.astype(jnp.bfloat16), w6[...],
                      preferred_element_type=jnp.float32) + b6[...]
        o_ref[...] = jnp.tanh(out).astype(o_ref.dtype)

    return vae_kernel


# ------------------------------ wrapper -------------------------------------
def vae_forward(x, kernel_params, batch_tile=None):
    """x: [B, INPUT_DIM] float32. Returns [B, INPUT_DIM] float32 (eval-mode VAE)."""
    B, d_in = x.shape
    assert d_in == INPUT_DIM
    if x.dtype != jnp.float32:
        x = x.astype(jnp.float32)

    num_cores, ew_bf16 = _detect_chip()
    tile = batch_tile if batch_tile is not None else _choose_batch_tile(B, num_cores)
    B_pad = _round_up(B, tile)

    # Pad only the batch remainder, and only when needed (no lane padding).
    x_p = x if B_pad == B else jnp.pad(x, ((0, B_pad - B), (0, 0)))

    flat = [t for wb in kernel_params for t in wb]

    x_spec = pl.BlockSpec((tile, INPUT_DIM), lambda i: (i, 0))
    out_spec = pl.BlockSpec((tile, INPUT_DIM), lambda i: (i, 0))
    # Whole-array blocks with a constant index_map: weights are DMA'd once and
    # stay resident in VMEM across all batch tiles.
    param_specs = [pl.BlockSpec(p.shape, lambda i: (0, 0)) for p in flat]

    out_p = pl.pallas_call(
        make_vae_kernel(ew_bf16),
        out_shape=jax.ShapeDtypeStruct((B_pad, INPUT_DIM), jnp.float32),
        grid_spec=pltpu.PrefetchScalarGridSpec(
            num_scalar_prefetch=0,
            grid=(B_pad // tile,),
            in_specs=[x_spec] + param_specs,
            out_specs=out_spec,
        ),
        compiler_params=pltpu.CompilerParams(
            dimension_semantics=("parallel",),
        ),
    )(x_p, *flat)

    return out_p if B_pad == B else out_p[:B]


# --------------------------- parameter handling ------------------------------
def _init_linear(key, fan_in, fan_out):
    """PyTorch nn.Linear default init, stored as [in, out]."""
    kw, kb = jax.random.split(key)
    bound = 1.0 / np.sqrt(fan_in)
    w = jax.random.uniform(kw, (fan_in, fan_out), jnp.float32, -bound, bound)
    b = jax.random.uniform(kb, (1, fan_out), jnp.float32, -bound, bound)
    return w, b


def make_exact_params(key):
    """f32, natural-shape parameters matching the PyTorch module (eval-path layers).
    fc22 (logvar) is dead in the eval forward and is omitted."""
    dims = [
        (INPUT_DIM, H1),   # efc1
        (H1, H2),          # efc2
        (H2, H3),          # efc3
        (H3, Z_DIM),       # fc21 (mu)
        (Z_DIM, H3),       # dfc3
        (H3, H2),          # dfc4
        (H2, H1),          # dfc5
        (H1, INPUT_DIM),   # dfc6
    ]
    keys = jax.random.split(key, len(dims))
    return [_init_linear(k, fi, fo) for k, (fi, fo) in zip(keys, dims)]


def build_kernel_params(exact):
    """Fuse fc21 . dfc3, cast weights to bf16, keep biases in f32.  No padding:
    the kernel works directly on the natural 136-wide feature dims."""
    (w1, b1), (w2, b2), (w3, b3), (w21, b21), \
        (wd3, bd3), (wd4, bd4), (wd5, bd5), (wd6, bd6) = exact

    hi = jax.lax.Precision.HIGHEST
    wz = jnp.dot(w21, wd3, precision=hi)                 # [128, 128]
    bz = jnp.dot(b21, wd3, precision=hi) + bd3           # [1, 128]

    bf = lambda w: w.astype(jnp.bfloat16)
    f32 = lambda b: b.astype(jnp.float32)

    return [
        (bf(w1), f32(b1)),
        (bf(w2), f32(b2)),
        (bf(w3), f32(b3)),
        (bf(wz), f32(bz)),
        (bf(wd4), f32(bd4)),
        (bf(wd5), f32(bd5)),
        (bf(wd6), f32(bd6)),
    ]


def vae_forward_ref(x, exact):
    """Plain-JAX f32 reference (eval-mode forward, unfused) for verification."""
    (w1, b1), (w2, b2), (w3, b3), (w21, b21), \
        (wd3, bd3), (wd4, bd4), (wd5, bd5), (wd6, bd6) = exact
    hi = jax.lax.Precision.HIGHEST
    dot = lambda a, w: jnp.dot(a, w, precision=hi)
    h = jax.nn.relu(dot(x, w1) + b1)
    h = jax.nn.relu(dot(h, w2) + b2)
    h = jax.nn.relu(dot(h, w3) + b3)
    mu = dot(h, w21) + b21
    d = jax.nn.relu(dot(mu, wd3) + bd3)
    d = jax.nn.relu(dot(d, wd4) + bd4)
    d = jax.nn.relu(dot(d, wd5) + bd5)
    return jnp.tanh(dot(d, wd6) + bd6)


# --------------------------------- main --------------------------------------
if __name__ == "__main__":
    key = jax.random.PRNGKey(0)
    kx, kp = jax.random.split(key)

    B = 16   # small demo batch; wrapper handles any B (pads remainder if needed)
    x = jax.random.normal(kx, (B, INPUT_DIM), jnp.float32)

    exact_params = make_exact_params(kp)
    kernel_params = build_kernel_params(exact_params)

    out = jax.block_until_ready(vae_forward(x, kernel_params))

    ref = vae_forward_ref(x, exact_params)
    # bf16 MXU operands (and bf16 epilogue on v6e/v7x) with f32 accumulation
    # -> loosened tolerance vs the pure-f32 reference.
    np.testing.assert_allclose(np.asarray(out), np.asarray(ref),
                               rtol=5e-2, atol=5e-2)

    print("KERNEL_OK")
</pallas_src>

<mosaic_0001>
module attributes {stable_mosaic.version = 11 : i64} {
  func.func @vae_kernel(%arg0: i32, %arg1: memref<16x136xf32, #tpu.memory_space<vmem>>, %arg2: memref<136x512xbf16, #tpu.memory_space<vmem>>, %arg3: memref<1x512xf32, #tpu.memory_space<vmem>>, %arg4: memref<512x256xbf16, #tpu.memory_space<vmem>>, %arg5: memref<1x256xf32, #tpu.memory_space<vmem>>, %arg6: memref<256x128xbf16, #tpu.memory_space<vmem>>, %arg7: memref<1x128xf32, #tpu.memory_space<vmem>>, %arg8: memref<128x128xbf16, #tpu.memory_space<vmem>>, %arg9: memref<1x128xf32, #tpu.memory_space<vmem>>, %arg10: memref<128x256xbf16, #tpu.memory_space<vmem>>, %arg11: memref<1x256xf32, #tpu.memory_space<vmem>>, %arg12: memref<256x512xbf16, #tpu.memory_space<vmem>>, %arg13: memref<1x512xf32, #tpu.memory_space<vmem>>, %arg14: memref<512x136xbf16, #tpu.memory_space<vmem>>, %arg15: memref<1x136xf32, #tpu.memory_space<vmem>>, %arg16: memref<16x136xf32, #tpu.memory_space<vmem>>) attributes {dimension_semantics = [#tpu.dimension_semantics<parallel>], iteration_bounds = array<i64: 1>, scalar_prefetch = 0 : i64, scratch_operands = 0 : i64, tpu.core_type = #tpu.core_type<tc>, window_params = [{transform_indices = @transform_0, window_bounds = array<i64: 16, 136>}, {pipeline_mode = #tpu.pipeline_mode<synchronous>, transform_indices = @transform_1, window_bounds = array<i64: 136, 512>}, {pipeline_mode = #tpu.pipeline_mode<synchronous>, transform_indices = @transform_2, window_bounds = array<i64: 1, 512>}, {pipeline_mode = #tpu.pipeline_mode<synchronous>, transform_indices = @transform_3, window_bounds = array<i64: 512, 256>}, {pipeline_mode = #tpu.pipeline_mode<synchronous>, transform_indices = @transform_4, window_bounds = array<i64: 1, 256>}, {pipeline_mode = #tpu.pipeline_mode<synchronous>, transform_indices = @transform_5, window_bounds = array<i64: 256, 128>}, {pipeline_mode = #tpu.pipeline_mode<synchronous>, transform_indices = @transform_6, window_bounds = array<i64: 1, 128>}, {pipeline_mode = #tpu.pipeline_mode<synchronous>, transform_indices = @transform_7, window_bounds = array<i64: 128, 128>}, {pipeline_mode = #tpu.pipeline_mode<synchronous>, transform_indices = @transform_8, window_bounds = array<i64: 1, 128>}, {pipeline_mode = #tpu.pipeline_mode<synchronous>, transform_indices = @transform_9, window_bounds = array<i64: 128, 256>}, {pipeline_mode = #tpu.pipeline_mode<synchronous>, transform_indices = @transform_10, window_bounds = array<i64: 1, 256>}, {pipeline_mode = #tpu.pipeline_mode<synchronous>, transform_indices = @transform_11, window_bounds = array<i64: 256, 512>}, {pipeline_mode = #tpu.pipeline_mode<synchronous>, transform_indices = @transform_12, window_bounds = array<i64: 1, 512>}, {pipeline_mode = #tpu.pipeline_mode<synchronous>, transform_indices = @transform_13, window_bounds = array<i64: 512, 136>}, {pipeline_mode = #tpu.pipeline_mode<synchronous>, transform_indices = @transform_14, window_bounds = array<i64: 1, 136>}, {transform_indices = @transform_15, window_bounds = array<i64: 16, 136>}]} {
    %c0 = arith.constant 0 : index
    %c0_0 = arith.constant 0 : index
    %0 = vector.load %arg1[%c0, %c0_0] : memref<16x136xf32, #tpu.memory_space<vmem>>, vector<16x136xf32>
    %1 = arith.truncf %0 : vector<16x136xf32> to vector<16x136xbf16>
    %c0_1 = arith.constant 0 : index
    %c0_2 = arith.constant 0 : index
    %2 = vector.load %arg2[%c0_1, %c0_2] : memref<136x512xbf16, #tpu.memory_space<vmem>>, vector<136x512xbf16>
    %cst = arith.constant dense<0.000000e+00> : vector<16x512xf32>
    %3 = tpu.matmul %1, %2, %cst {dimension_numbers = #tpu.dot_dimension_numbers<[1], [0], [0], [1], [0, 0, 1, 1], [], []>} : vector<16x136xbf16>, vector<136x512xbf16>, vector<16x512xf32> -> vector<16x512xf32>
    %c0_3 = arith.constant 0 : index
    %c0_4 = arith.constant 0 : index
    %4 = vector.load %arg3[%c0_3, %c0_4] : memref<1x512xf32, #tpu.memory_space<vmem>>, vector<1x512xf32>
    %5 = vector.broadcast %4 : vector<1x512xf32> to vector<16x512xf32>
    %6 = arith.addf %3, %5 : vector<16x512xf32>
    %cst_5 = arith.constant 0.000000e+00 : f32
    %7 = vector.broadcast %cst_5 : f32 to vector<16x512xf32>
    %8 = arith.maximumf %6, %7 : vector<16x512xf32>
    %9 = arith.truncf %8 : vector<16x512xf32> to vector<16x512xbf16>
    %c0_6 = arith.constant 0 : index
    %c0_7 = arith.constant 0 : index
    %10 = vector.load %arg4[%c0_6, %c0_7] : memref<512x256xbf16, #tpu.memory_space<vmem>>, vector<512x256xbf16>
    %cst_8 = arith.constant dense<0.000000e+00> : vector<16x256xf32>
    %11 = tpu.matmul %9, %10, %cst_8 {dimension_numbers = #tpu.dot_dimension_numbers<[1], [0], [0], [1], [0, 0, 1, 1], [], []>} : vector<16x512xbf16>, vector<512x256xbf16>, vector<16x256xf32> -> vector<16x256xf32>
    %c0_9 = arith.constant 0 : index
    %c0_10 = arith.constant 0 : index
    %12 = vector.load %arg5[%c0_9, %c0_10] : memref<1x256xf32, #tpu.memory_space<vmem>>, vector<1x256xf32>
    %13 = vector.broadcast %12 : vector<1x256xf32> to vector<16x256xf32>
    %14 = arith.addf %11, %13 : vector<16x256xf32>
    %cst_11 = arith.constant 0.000000e+00 : f32
    %15 = vector.broadcast %cst_11 : f32 to vector<16x256xf32>
    %16 = arith.maximumf %14, %15 : vector<16x256xf32>
    %17 = arith.truncf %16 : vector<16x256xf32> to vector<16x256xbf16>
    %c0_12 = arith.constant 0 : index
    %c0_13 = arith.constant 0 : index
    %18 = vector.load %arg6[%c0_12, %c0_13] : memref<256x128xbf16, #tpu.memory_space<vmem>>, vector<256x128xbf16>
    %cst_14 = arith.constant dense<0.000000e+00> : vector<16x128xf32>
    %19 = tpu.matmul %17, %18, %cst_14 {dimension_numbers = #tpu.dot_dimension_numbers<[1], [0], [0], [1], [0, 0, 1, 1], [], []>} : vector<16x256xbf16>, vector<256x128xbf16>, vector<16x128xf32> -> vector<16x128xf32>
    %c0_15 = arith.constant 0 : index
    %c0_16 = arith.constant 0 : index
    %20 = vector.load %arg7[%c0_15, %c0_16] : memref<1x128xf32, #tpu.memory_space<vmem>>, vector<1x128xf32>
    %21 = vector.broadcast %20 : vector<1x128xf32> to vector<16x128xf32>
    %22 = arith.addf %19, %21 : vector<16x128xf32>
    %cst_17 = arith.constant 0.000000e+00 : f32
    %23 = vector.broadcast %cst_17 : f32 to vector<16x128xf32>
    %24 = arith.maximumf %22, %23 : vector<16x128xf32>
    %25 = arith.truncf %24 : vector<16x128xf32> to vector<16x128xbf16>
    %c0_18 = arith.constant 0 : index
    %c0_19 = arith.constant 0 : index
    %26 = vector.load %arg8[%c0_18, %c0_19] : memref<128x128xbf16, #tpu.memory_space<vmem>>, vector<128x128xbf16>
    %cst_20 = arith.constant dense<0.000000e+00> : vector<16x128xf32>
    %27 = tpu.matmul %25, %26, %cst_20 {dimension_numbers = #tpu.dot_dimension_numbers<[1], [0], [0], [1], [0, 0, 1, 1], [], []>} : vector<16x128xbf16>, vector<128x128xbf16>, vector<16x128xf32> -> vector<16x128xf32>
    %c0_21 = arith.constant 0 : index
    %c0_22 = arith.constant 0 : index
    %28 = vector.load %arg9[%c0_21, %c0_22] : memref<1x128xf32, #tpu.memory_space<vmem>>, vector<1x128xf32>
    %29 = vector.broadcast %28 : vector<1x128xf32> to vector<16x128xf32>
    %30 = arith.addf %27, %29 : vector<16x128xf32>
    %cst_23 = arith.constant 0.000000e+00 : f32
    %31 = vector.broadcast %cst_23 : f32 to vector<16x128xf32>
    %32 = arith.maximumf %30, %31 : vector<16x128xf32>
    %33 = arith.truncf %32 : vector<16x128xf32> to vector<16x128xbf16>
    %c0_24 = arith.constant 0 : index
    %c0_25 = arith.constant 0 : index
    %34 = vector.load %arg10[%c0_24, %c0_25] : memref<128x256xbf16, #tpu.memory_space<vmem>>, vector<128x256xbf16>
    %cst_26 = arith.constant dense<0.000000e+00> : vector<16x256xf32>
    %35 = tpu.matmul %33, %34, %cst_26 {dimension_numbers = #tpu.dot_dimension_numbers<[1], [0], [0], [1], [0, 0, 1, 1], [], []>} : vector<16x128xbf16>, vector<128x256xbf16>, vector<16x256xf32> -> vector<16x256xf32>
    %c0_27 = arith.constant 0 : index
    %c0_28 = arith.constant 0 : index
    %36 = vector.load %arg11[%c0_27, %c0_28] : memref<1x256xf32, #tpu.memory_space<vmem>>, vector<1x256xf32>
    %37 = vector.broadcast %36 : vector<1x256xf32> to vector<16x256xf32>
    %38 = arith.addf %35, %37 : vector<16x256xf32>
    %cst_29 = arith.constant 0.000000e+00 : f32
    %39 = vector.broadcast %cst_29 : f32 to vector<16x256xf32>
    %40 = arith.maximumf %38, %39 : vector<16x256xf32>
    %41 = arith.truncf %40 : vector<16x256xf32> to vector<16x256xbf16>
    %c0_30 = arith.constant 0 : index
    %c0_31 = arith.constant 0 : index
    %42 = vector.load %arg12[%c0_30, %c0_31] : memref<256x512xbf16, #tpu.memory_space<vmem>>, vector<256x512xbf16>
    %cst_32 = arith.constant dense<0.000000e+00> : vector<16x512xf32>
    %43 = tpu.matmul %41, %42, %cst_32 {dimension_numbers = #tpu.dot_dimension_numbers<[1], [0], [0], [1], [0, 0, 1, 1], [], []>} : vector<16x256xbf16>, vector<256x512xbf16>, vector<16x512xf32> -> vector<16x512xf32>
    %c0_33 = arith.constant 0 : index
    %c0_34 = arith.constant 0 : index
    %44 = vector.load %arg13[%c0_33, %c0_34] : memref<1x512xf32, #tpu.memory_space<vmem>>, vector<1x512xf32>
    %45 = vector.broadcast %44 : vector<1x512xf32> to vector<16x512xf32>
    %46 = arith.addf %43, %45 : vector<16x512xf32>
    %cst_35 = arith.constant 0.000000e+00 : f32
    %47 = vector.broadcast %cst_35 : f32 to vector<16x512xf32>
    %48 = arith.maximumf %46, %47 : vector<16x512xf32>
    %49 = arith.truncf %48 : vector<16x512xf32> to vector<16x512xbf16>
    %c0_36 = arith.constant 0 : index
    %c0_37 = arith.constant 0 : index
    %50 = vector.load %arg14[%c0_36, %c0_37] : memref<512x136xbf16, #tpu.memory_space<vmem>>, vector<512x136xbf16>
    %cst_38 = arith.constant dense<0.000000e+00> : vector<16x136xf32>
    %51 = tpu.matmul %49, %50, %cst_38 {dimension_numbers = #tpu.dot_dimension_numbers<[1], [0], [0], [1], [0, 0, 1, 1], [], []>} : vector<16x512xbf16>, vector<512x136xbf16>, vector<16x136xf32> -> vector<16x136xf32>
    %c0_39 = arith.constant 0 : index
    %c0_40 = arith.constant 0 : index
    %52 = vector.load %arg15[%c0_39, %c0_40] : memref<1x136xf32, #tpu.memory_space<vmem>>, vector<1x136xf32>
    %53 = vector.broadcast %52 : vector<1x136xf32> to vector<16x136xf32>
    %54 = arith.addf %51, %53 : vector<16x136xf32>
    %55 = math.tanh %54 : vector<16x136xf32>
    %c0_41 = arith.constant 0 : index
    %c0_42 = arith.constant 0 : index
    %56 = vector.load %arg16[%c0_41, %c0_42] : memref<16x136xf32, #tpu.memory_space<vmem>>, vector<16x136xf32>
    tpu.vector_store %arg16[%c0_41, %c0_42], %55 {strides = array<i32>} : memref<16x136xf32, #tpu.memory_space<vmem>>, vector<16x136xf32>,
    return
  }
  func.func @transform_0(%arg0: i32) -> (i32, i32) {
    %c0_i32 = arith.constant 0 : i32
    %c0_i32_0 = arith.constant 0 : i32
    return %arg0, %c0_i32 : i32, i32
  }
  func.func @transform_1(%arg0: i32) -> (i32, i32) {
    %c0_i32 = arith.constant 0 : i32
    %c0_i32_0 = arith.constant 0 : i32
    %c0_i32_1 = arith.constant 0 : i32
    return %c0_i32, %c0_i32_0 : i32, i32
  }
  func.func @transform_2(%arg0: i32) -> (i32, i32) {
    %c0_i32 = arith.constant 0 : i32
    %c0_i32_0 = arith.constant 0 : i32
    %c0_i32_1 = arith.constant 0 : i32
    return %c0_i32, %c0_i32_0 : i32, i32
  }
  func.func @transform_3(%arg0: i32) -> (i32, i32) {
    %c0_i32 = arith.constant 0 : i32
    %c0_i32_0 = arith.constant 0 : i32
    %c0_i32_1 = arith.constant 0 : i32
    return %c0_i32, %c0_i32_0 : i32, i32
  }
  func.func @transform_4(%arg0: i32) -> (i32, i32) {
    %c0_i32 = arith.constant 0 : i32
    %c0_i32_0 = arith.constant 0 : i32
    %c0_i32_1 = arith.constant 0 : i32
    return %c0_i32, %c0_i32_0 : i32, i32
  }
  func.func @transform_5(%arg0: i32) -> (i32, i32) {
    %c0_i32 = arith.constant 0 : i32
    %c0_i32_0 = arith.constant 0 : i32
    %c0_i32_1 = arith.constant 0 : i32
    return %c0_i32, %c0_i32_0 : i32, i32
  }
  func.func @transform_6(%arg0: i32) -> (i32, i32) {
    %c0_i32 = arith.constant 0 : i32
    %c0_i32_0 = arith.constant 0 : i32
    %c0_i32_1 = arith.constant 0 : i32
    return %c0_i32, %c0_i32_0 : i32, i32
  }
  func.func @transform_7(%arg0: i32) -> (i32, i32) {
    %c0_i32 = arith.constant 0 : i32
    %c0_i32_0 = arith.constant 0 : i32
    %c0_i32_1 = arith.constant 0 : i32
    return %c0_i32, %c0_i32_0 : i32, i32
  }
  func.func @transform_8(%arg0: i32) -> (i32, i32) {
    %c0_i32 = arith.constant 0 : i32
    %c0_i32_0 = arith.constant 0 : i32
    %c0_i32_1 = arith.constant 0 : i32
    return %c0_i32, %c0_i32_0 : i32, i32
  }
  func.func @transform_9(%arg0: i32) -> (i32, i32) {
    %c0_i32 = arith.constant 0 : i32
    %c0_i32_0 = arith.constant 0 : i32
    %c0_i32_1 = arith.constant 0 : i32
    return %c0_i32, %c0_i32_0 : i32, i32
  }
  func.func @transform_10(%arg0: i32) -> (i32, i32) {
    %c0_i32 = arith.constant 0 : i32
    %c0_i32_0 = arith.constant 0 : i32
    %c0_i32_1 = arith.constant 0 : i32
    return %c0_i32, %c0_i32_0 : i32, i32
  }
  func.func @transform_11(%arg0: i32) -> (i32, i32) {
    %c0_i32 = arith.constant 0 : i32
    %c0_i32_0 = arith.constant 0 : i32
    %c0_i32_1 = arith.constant 0 : i32
    return %c0_i32, %c0_i32_0 : i32, i32
  }
  func.func @transform_12(%arg0: i32) -> (i32, i32) {
    %c0_i32 = arith.constant 0 : i32
    %c0_i32_0 = arith.constant 0 : i32
    %c0_i32_1 = arith.constant 0 : i32
    return %c0_i32, %c0_i32_0 : i32, i32
  }
  func.func @transform_13(%arg0: i32) -> (i32, i32) {
    %c0_i32 = arith.constant 0 : i32
    %c0_i32_0 = arith.constant 0 : i32
    %c0_i32_1 = arith.constant 0 : i32
    return %c0_i32, %c0_i32_0 : i32, i32
  }
  func.func @transform_14(%arg0: i32) -> (i32, i32) {
    %c0_i32 = arith.constant 0 : i32
    %c0_i32_0 = arith.constant 0 : i32
    %c0_i32_1 = arith.constant 0 : i32
    return %c0_i32, %c0_i32_0 : i32, i32
  }
  func.func @transform_15(%arg0: i32) -> (i32, i32) {
    %c0_i32 = arith.constant 0 : i32
    %c0_i32_0 = arith.constant 0 : i32
    return %arg0, %c0_i32 : i32, i32
  }
}

</mosaic_0001>

<bundles_post_ra>
// kernel: tpu_custom_call.1
= control target key start
LH: loop header
LB: loop body
LE: loop exit
PB: predicated region body
PF: predicated region fallthrough
CT: control target
= control target key end

     0   :  { %20 = vsyncpa [#allocation3], 0  ;;  %s4020_s0 = inlined_call_operand.hbm [shape: f32[16,136], index: 0, kind: input, shape index: {}]   ;;  %s4021_s1 = inlined_call_operand.vmem [shape: bf16[136,512], index: 1, kind: input, shape index: {}]   ;;  %s4022_s2 = inlined_call_operand.vmem [shape: f32[1,512], index: 2, kind: input, shape index: {}]   ;;  %s4023_s3 = inlined_call_operand.vmem [shape: bf16[512,256], index: 3, kind: input, shape index: {}]   ;;  %s4024_s4 = inlined_call_operand.hbm [shape: f32[1,256], index: 4, kind: input, shape index: {}]   ;;  %s4025_s5 = inlined_call_operand.hbm [shape: bf16[256,128], index: 5, kind: input, shape index: {}]   ;;  %s4026_s6 = inlined_call_operand.vmem [shape: f32[1,128], index: 6, kind: input, shape index: {}]   ;;  %s4027_s7 = inlined_call_operand.hbm [shape: bf16[128,128], index: 7, kind: input, shape index: {}]   ;;  %s4028_s8 = inlined_call_operand.hbm [shape: f32[1,128], index: 8, kind: input, shape index: {}]   ;;  %s4029_s9 = inlined_call_operand.hbm [shape: bf16[128,256], index: 9, kind: input, shape index: {}]   ;;  %s4030_s10 = inlined_call_operand.vmem [shape: f32[1,256], index: 10, kind: input, shape index: {}]   ;;  %s4031_s11 = inlined_call_operand.hbm [shape: bf16[256,512], index: 11, kind: input, shape index: {}]   ;;  %s4032_s12 = inlined_call_operand.vmem [shape: f32[1,512], index: 12, kind: input, shape index: {}]   ;;  %s4033_s13 = inlined_call_operand.vmem [shape: bf16[512,136], index: 13, kind: input, shape index: {}]   ;;  %s4034_s14 = inlined_call_operand.vmem [shape: f32[1,136], index: 14, kind: input, shape index: {}]   ;;  %s4035_s15 = inlined_call_operand.hbm [shape: f32[16,136], index: 15, kind: output, shape index: {}]  }
   0x1   :  { %21 = vsyncpa [#allocation6], 0 }
   0x2   :  { %22 = vsyncpa [#allocation9], 0 }
   0x3   :  { %23 = vsyncpa [#allocation12], 0 }
   0x4   :  { %24 = vsyncpa [#allocation4], 0  ;;  %s3351_s18 = smov [#allocation5]  }
   0x5   :  { %s49_s19 = sshll.u32 %s3351_s18, 4  ;;  %s50_s19 = int_to_ptr.vmem [resolvable:$true] %s49_s19 }
   0x6   :  { %s3189_s20 = scalar_lea.vmem %s50_s19, 32  ;;  %p3194_p1 = scmp.lt.s32.totalorder %s50_s19, %s50_s19 }
   0x7   :  { %p3190_p0 = scmp.ne.s32.totalorder %s50_s19, %s3189_s20  ;;  %p3195_p2 = scmp.lt.s32.totalorder %s3189_s20, %s3189_s20 }
   0x9   :  { %p3196_p3 = por %p3195_p2, %p3194_p1 }
   0xb   :  { %p3197_p4 = pnand %p3196_p3, %p3190_p0 }
   0xd   :  { %3200 = shalt.err (!%p3197_p4)
}
   0xe   :  { %52 = dma.hbm_to_vmem [thread:$0]  %s4024_s4, 32, %s50_s19, [#allocation6]  }
   0xf   :  { %s3352_s23 = smov [#allocation8]   ;;  %s3353_s25 = smov [#allocation11]  }
  0x10   :  { %s72_s24 = sshll.u32 %s3352_s23, 4  ;;  %s94_s26 = sshll.u32 %s3353_s25, 4  ;;  %s73_s24 = int_to_ptr.vmem [resolvable:$true] %s72_s24  ;;  %s95_s26 = int_to_ptr.vmem [resolvable:$true] %s94_s26 }
  0x11   :  { %s3209_s27 = scalar_lea.vmem %s73_s24, 1024  ;;  %p3214_p6 = scmp.lt.s32.totalorder %s73_s24, %s73_s24 }
  0x12   :  { %p3210_p5 = scmp.ne.s32.totalorder %s73_s24, %s3209_s27  ;;  %p3215_p7 = scmp.lt.s32.totalorder %s3209_s27, %s3209_s27 }
  0x14   :  { %p3216_p8 = por %p3215_p7, %p3214_p6 }
  0x16   :  { %p3217_p9 = pnand %p3216_p8, %p3210_p5 }
  0x18   :  { %3220 = shalt.err (!%p3217_p9)
}
  0x19   :  { %s3354_s28 = smov 64   ;;  %s3355_s29 = smov 4  }
  0x1a   :  { %78 = dma.hbm_to_vmem [thread:$0]  %s4027_s7, 1024, %s73_s24, [#allocation9], %s3354_s28, %s3354_s28, %s3355_s29  }
  0x1b   :  { %s3229_s4 = scalar_lea.vmem %s95_s26, 2048  ;;  %p3234_p11 = scmp.lt.s32.totalorder %s95_s26, %s95_s26 }
  0x1c   :  { %p3230_p10 = scmp.ne.s32.totalorder %s95_s26, %s3229_s4  ;;  %p3235_p12 = scmp.lt.s32.totalorder %s3229_s4, %s3229_s4 }
  0x1e   :  { %p3236_p13 = por %p3235_p12, %p3234_p11 }
  0x20   :  { %p3237_p0 = pnand %p3236_p13, %p3230_p10 }
  0x22   :  { %3240 = shalt.err (!%p3237_p0)
}
  0x23   :  { %s3356_s17 = smov 128   ;;  %s3357_s18 = smov 8  }
  0x24   :  { %100 = dma.hbm_to_vmem [thread:$0]  %s4029_s9, 2048, %s95_s26, [#allocation12], %s3356_s17, %s3356_s17, %s3357_s18  }
  0x25   :  { %s3358_s21 = smov [#allocation2]  }
  0x26   :  { %s30_s22 = sshll.u32 %s3358_s21, 4  ;;  %s31_s22 = int_to_ptr.vmem [resolvable:$true] %s30_s22 }
  0x27   :  { %s3249_s23 = scalar_lea.vmem %s31_s22, 512  ;;  %p3254_p2 = scmp.lt.s32.totalorder %s31_s22, %s31_s22 }
  0x28   :  { %p3250_p1 = scmp.ne.s32.totalorder %s31_s22, %s3249_s23  ;;  %p3255_p3 = scmp.lt.s32.totalorder %s3249_s23, %s3249_s23 }
  0x2a   :  { %p3256_p4 = por %p3255_p3, %p3254_p2 }
  0x2c   :  { %p3257_p5 = pnand %p3256_p4, %p3250_p1 }
  0x2e   :  { %3260 = shalt.err (!%p3257_p5)
}
  0x2f   :  { %s3359_s7 = smov 256   ;;  %s3360_s24 = smov 16  }
  0x30   :  { %36 = dma.hbm_to_vmem [thread:$0]  %s4020_s0, 512, %s31_s22, [#allocation3], %s3359_s7, %s3359_s7, %s3360_s24  }
  0x31   :  { %s3361_s9 = smov [#allocation7]   ;;  %s3362_s30 = smov [#allocation10]  }
  0x32   :  { %s58_s26 = sshll.u32 %s3361_s9, 4  ;;  %s85_s16 = sshll.u32 %s3362_s30, 4  ;;  %s59_s26 = int_to_ptr.vmem [resolvable:$true] %s58_s26  ;;  %s86_s16 = int_to_ptr.vmem [resolvable:$true] %s85_s16 }
  0x33   :  { %s3269_s4 = scalar_lea.vmem %s59_s26, 2048  ;;  %p3274_p7 = scmp.lt.s32.totalorder %s59_s26, %s59_s26 }
  0x34   :  { %p3270_p6 = scmp.ne.s32.totalorder %s59_s26, %s3269_s4  ;;  %p3275_p8 = scmp.lt.s32.totalorder %s3269_s4, %s3269_s4 }
  0x36   :  { %p3276_p9 = por %p3275_p8, %p3274_p7 }
  0x38   :  { %p3277_p10 = pnand %p3276_p9, %p3270_p6 }
  0x3a   :  { %3280 = shalt.err (!%p3277_p10)
}
  0x3b   :  { %64 = dma.hbm_to_vmem [thread:$0]  %s4025_s5, 2048, %s59_s26, [#allocation6], %s3354_s28, %s3354_s28, %s3355_s29  }
  0x3c   :  { %s3289_s0 = scalar_lea.vmem %s86_s16, 16  ;;  %s3293_s19 = scalar_lea.vmem %s86_s16, 32 }
  0x3d   :  { %p3290_p11 = scmp.ne.s32.totalorder %s86_s16, %s3289_s0  ;;  %p3294_p12 = scmp.lt.s32.totalorder %s86_s16, %s86_s16 }
  0x3e   :  { %p3295_p13 = scmp.lt.s32.totalorder %s3293_s19, %s3289_s0 }
  0x40   :  { %p3296_p0 = por %p3295_p13, %p3294_p12 }
  0x42   :  { %p3297_p1 = pnand %p3296_p0, %p3290_p11 }
  0x44   :  { %3300 = shalt.err (!%p3297_p1)
}
  0x45   :  { %88 = dma.hbm_to_vmem [thread:$0]  %s4028_s8, 16, %s86_s16, [#allocation9]  }
  0x46   :  { %s3363_s22 = smov [#allocation13]  }
  0x47   :  { %s108_s23 = sshll.u32 %s3363_s22, 4  ;;  %s109_s23 = int_to_ptr.vmem [resolvable:$true] %s108_s23 }
  0x48   :  { %s3309_s25 = scalar_lea.vmem %s109_s23, 8192  ;;  %p3314_p3 = scmp.lt.s32.totalorder %s109_s23, %s109_s23 }
  0x49   :  { %p3310_p2 = scmp.ne.s32.totalorder %s109_s23, %s3309_s25  ;;  %p3315_p4 = scmp.lt.s32.totalorder %s3309_s25, %s3309_s25 }
  0x4b   :  { %p3316_p5 = por %p3315_p4, %p3314_p3 }
  0x4d   :  { %p3317_p6 = pnand %p3316_p5, %p3310_p2 }
  0x4f   :  { %3320 = shalt.err (!%p3317_p6)
}
  0x50   :  { %114 = dma.hbm_to_vmem [thread:$0]  %s4031_s11, 8192, %s109_s23, [#allocation12], %s3359_s7, %s3359_s7, %s3360_s24  }
  0x51   :  { %3341 = dma.done.wait [#allocation3], 512  }
  0x52   :  { %3342 = vsyncadd [#allocation3], 4294966784 }
  0x53   :  { %3343 = dma.done.wait [#allocation6], 2080  }
  0x54   :  { %3344 = vsyncadd [#allocation6], 4294965216 }
  0x55   :  { %3345 = dma.done.wait [#allocation9], 1040  }
  0x56   :  { %3346 = vsyncadd [#allocation9], 4294966256 }
  0x57   :  { %3347 = dma.done.wait [#allocation12], 10240  }
  0x58   :  { %3348 = vsyncadd [#allocation12], 4294957056  ;;  %v2785_v0 = vld [vmem:[%s4021_s1 + $0xe4] ss:$16 sps:$4 sm:$0xff]   ;;  %v2787_v1 = vld [vmem:[%s4021_s1 + $0xec] ss:$16 sps:$4 sm:$0xff]  }
  0x59   :  { %392 = vmatprep.subr.bf16.mxu0 %v2785_v0  ;;  %v2789_v2 = vld [vmem:[%s4021_s1 + $0xe0] ss:$16 sps:$4 sm:$0xff]   ;;  %v2790_v3 = vld [vmem:[%s4021_s1 + $0xe8] ss:$16 sps:$4 sm:$0xff]   ;;  %435 = vmatprep.subr.bf16.mxu1 %v2787_v1  ;;  %v2791_v4 = vld [vmem:[%s4021_s1 + $0xc4] ss:$16 sps:$4 sm:$0xff]  }
  0x5a   :  { %393 = vmatpush1.bf16.msra.mxu0 %v2789_v2  ;;  %436 = vmatpush1.bf16.msra.mxu1 %v2790_v3  ;;  %v2793_v5 = vld [vmem:[%s4021_s1 + $0xcc] ss:$16 sps:$4 sm:$0xff]   ;;  %v2795_v6 = vld [vmem:[%s4021_s1 + $0xc0] ss:$16 sps:$4 sm:$0xff]   ;;  %v2796_v7 = vld [vmem:[%s4021_s1 + $0xc8] ss:$16 sps:$4 sm:$0xff]  }
  0x5b   :  { %394 = vmatprep.subr.bf16.mxu0 %v2791_v4  ;;  %437 = vmatprep.subr.bf16.mxu1 %v2793_v5  ;;  %v2797_v8 = vld [vmem:[%s4021_s1 + $0xa4] ss:$16 sps:$4 sm:$0xff]   ;;  %v2799_v9 = vld [vmem:[%s4021_s1 + $0xac] ss:$16 sps:$4 sm:$0xff]   ;;  %v2801_v10 = vld [vmem:[%s4021_s1 + $0xa0] ss:$16 sps:$4 sm:$0xff]  }
  0x5c   :  { %v2802_v11 = vld [vmem:[%s4021_s1 + $0xa8] ss:$16 sps:$4 sm:$0xff]   ;;  %v2803_v12 = vld [vmem:[%s4021_s1 + $0x84] ss:$16 sps:$4 sm:$0xff]   ;;  %v2805_v13 = vld [vmem:[%s4021_s1 + $0x8c] ss:$16 sps:$4 sm:$0xff]  }
  0x5d   :  { %v2807_v14 = vld [vmem:[%s4021_s1 + $0x80] ss:$16 sps:$4 sm:$0xff]   ;;  %v2808_v15 = vld [vmem:[%s4021_s1 + $0x88] ss:$16 sps:$4 sm:$0xff]   ;;  %v2809_v16 = vld [vmem:[%s4021_s1 + $0x64] ss:$16 sps:$4 sm:$0xff]  }
  0x5e   :  { %395 = vmatpush1.bf16.msra.mxu0 %v2795_v6  ;;  %438 = vmatpush1.bf16.msra.mxu1 %v2796_v7  ;;  %v2811_v17 = vld [vmem:[%s4021_s1 + $0x6c] ss:$16 sps:$4 sm:$0xff]   ;;  %v2813_v18 = vld [vmem:[%s4021_s1 + $0x60] ss:$16 sps:$4 sm:$0xff]   ;;  %v2814_v19 = vld [vmem:[%s4021_s1 + $0x68] ss:$16 sps:$4 sm:$0xff]  }
  0x5f   :  { %396 = vmatprep.subr.bf16.mxu0 %v2797_v8  ;;  %439 = vmatprep.subr.bf16.mxu1 %v2799_v9  ;;  %v2815_v20 = vld [vmem:[%s4021_s1 + $0x44] ss:$16 sps:$4 sm:$0xff]   ;;  %v2817_v21 = vld [vmem:[%s4021_s1 + $0x4c] ss:$16 sps:$4 sm:$0xff]   ;;  %v2819_v22 = vld [vmem:[%s4021_s1 + $0x40] ss:$16 sps:$4 sm:$0xff]  }
  0x60   :  { %v2820_v23 = vld [vmem:[%s4021_s1 + $0x48] ss:$16 sps:$4 sm:$0xff]   ;;  %v2821_v24 = vld [vmem:[%s4021_s1 + $0x24] ss:$16 sps:$4 sm:$0xff]   ;;  %v2823_v25 = vld [vmem:[%s4021_s1 + $0x2c] ss:$16 sps:$4 sm:$0xff]  }
  0x61   :  { %v144_v26 = vld [vmem:[#allocation2 + $0x8] sm:$0xff]  ;;  %v146_v27 = vld [vmem:[#allocation2 + $0x18] sm:$0xff]  ;;  %v2825_v28 = vld [vmem:[%s4021_s1 + $0x20] ss:$16 sps:$4 sm:$0xff]   ;;  %vm375_vm0 = vcmask 64512   ;;  %vm379_vm1 = vcmask 1043456  }
  0x62   :  { %397 = vmatpush1.bf16.msra.mxu0 %v2801_v10  ;;  %440 = vmatpush1.bf16.msra.mxu1 %v2802_v11  ;;  %v148_v29 = vpack.c.bf16 %v146_v27, %v144_v26  ;;  %v2826_v30 = vld [vmem:[%s4021_s1 + $0x28] ss:$16 sps:$4 sm:$0xff]   ;;  %v2827_v31 = vld [vmem:[%s4021_s1 + $0x4] ss:$16 sps:$4 sm:$0xff]   ;;  %v2829_v32 = vld [vmem:[%s4021_s1 + $0xc] ss:$16 sps:$4 sm:$0xff]  }
  0x63   :  { %398 = vmatprep.subr.bf16.mxu0 %v2803_v12  ;;  %441 = vmatprep.subr.bf16.mxu1 %v2805_v13  ;;  %v181_v33 = vld [vmem:[%s4021_s1 + $0x100] sm:$0xff]  ;;  %v182_v34 = vld [vmem:[%s4021_s1 + $0x108] sm:$0xff]  ;;  %v145_v42 = vld [vmem:[#allocation2 + $0x10] sm:$0xff]  ;;  %vm3365_vm2 = vmmov 0  }
  0x64   :  { %2480 = vmatprep.mubr.msk.bf16.mxu0 %vm375_vm0, %v148_v29  ;;  %2482 = vmatprep.mubr.msk.bf16.mxu1 %vm375_vm0, %v148_v29  ;;  %v2831_v35 = vld [vmem:[%s4021_s1] ss:$16 sps:$4 sm:$0xff]   ;;  %v2832_v36 = vld [vmem:[%s4021_s1 + $0x8] ss:$16 sps:$4 sm:$0xff]   ;;  %v2476_v37 = vcombine.high %v181_v33, %v181_v33  ;;  %v2478_v38 = vcombine.high %v182_v34, %v182_v34  ;;  %v2475_v39 = vcombine.low %v181_v33, %v181_v33  ;;  %v2839_v43 = vld [vmem:[%s4023_s3 + $0x74] ss:$8 sps:$4 sm:$0xff]  }
  0x65   :  { %v2477_v40 = vcombine.low %v182_v34, %v182_v34  ;;  %v143_v41 = vld [vmem:[#allocation2] sm:$0xff]  ;;  %v2842_v46 = vld [vmem:[%s4023_s3 + $0x174] ss:$8 sps:$4 sm:$0xff]   ;;  %v2837_v48 = vld [vmem:[%s4023_s3 + $0x70] ss:$8 sps:$4 sm:$0xff]  }
  0x66   :  { %399 = vmatpush1.bf16.msra.mxu0 %v2807_v14  ;;  %442 = vmatpush1.bf16.msra.mxu1 %v2808_v15  ;;  %v381_v44 = vsel %vm379_vm1, %v2475_v39, 0  ;;  %v147_v47 = vpack.c.bf16 %v145_v42, %v143_v41  ;;  %v2840_v49 = vld [vmem:[%s4023_s3 + $0x170] ss:$8 sps:$4 sm:$0xff]   ;;  %v2845_v50 = vld [vmem:[%s4023_s3 + $0x64] ss:$8 sps:$4 sm:$0xff]  }
  0x67   :  { %400 = vmatprep.subr.bf16.mxu0 %v2809_v16  ;;  %443 = vmatprep.subr.bf16.mxu1 %v2811_v17  ;;  %v387_v45 = vsel %vm379_vm1, %v2477_v40, 0  ;;  %v2848_v51 = vld [vmem:[%s4023_s3 + $0x164] ss:$8 sps:$4 sm:$0xff]   ;;  %v2843_v52 = vld [vmem:[%s4023_s3 + $0x60] ss:$8 sps:$4 sm:$0xff]  }
  0x68   :  { %v2846_v53 = vld [vmem:[%s4023_s3 + $0x160] ss:$8 sps:$4 sm:$0xff]   ;;  %v2851_v54 = vld [vmem:[%s4023_s3 + $0x54] ss:$8 sps:$4 sm:$0xff]   ;;  %v2849_v56 = vld [vmem:[%s4023_s3 + $0x50] ss:$8 sps:$4 sm:$0xff]  }
  0x69   :  { %v2854_v55 = vld [vmem:[%s4023_s3 + $0x154] ss:$8 sps:$4 sm:$0xff]   ;;  %v2852_v57 = vld [vmem:[%s4023_s3 + $0x150] ss:$8 sps:$4 sm:$0xff]   ;;  %v2857_v58 = vld [vmem:[%s4023_s3 + $0x44] ss:$8 sps:$4 sm:$0xff]  }
  0x6a   :  { %401 = vmatpush1.bf16.msra.mxu0 %v2813_v18  ;;  %444 = vmatpush1.bf16.msra.mxu1 %v2814_v19  ;;  %v2860_v59 = vld [vmem:[%s4023_s3 + $0x144] ss:$8 sps:$4 sm:$0xff]   ;;  %v2855_v60 = vld [vmem:[%s4023_s3 + $0x40] ss:$8 sps:$4 sm:$0xff]   ;;  %v2863_v62 = vld [vmem:[%s4023_s3 + $0x34] ss:$8 sps:$4 sm:$0xff]  }
  0x6b   :  { %402 = vmatprep.subr.bf16.mxu0 %v2815_v20  ;;  %445 = vmatprep.subr.bf16.mxu1 %v2817_v21  ;;  %v2858_v61 = vld [vmem:[%s4023_s3 + $0x140] ss:$8 sps:$4 sm:$0xff]   ;;  %v2866_v63 = vld [vmem:[%s4023_s3 + $0x134] ss:$8 sps:$4 sm:$0xff]   ;;  %v2861_v0 = vld [vmem:[%s4023_s3 + $0x30] ss:$8 sps:$4 sm:$0xff]  }
  0x6c   :  { %v2864_v1 = vld [vmem:[%s4023_s3 + $0x130] ss:$8 sps:$4 sm:$0xff]   ;;  %v2869_v2 = vld [vmem:[%s4023_s3 + $0x24] ss:$8 sps:$4 sm:$0xff]   ;;  %v2867_v4 = vld [vmem:[%s4023_s3 + $0x20] ss:$8 sps:$4 sm:$0xff]  }
  0x6d   :  { %v2872_v3 = vld [vmem:[%s4023_s3 + $0x124] ss:$8 sps:$4 sm:$0xff]   ;;  %v2870_v5 = vld [vmem:[%s4023_s3 + $0x120] ss:$8 sps:$4 sm:$0xff]   ;;  %v2875_v6 = vld [vmem:[%s4023_s3 + $0x14] ss:$8 sps:$4 sm:$0xff]  }
  0x6e   :  { %403 = vmatpush1.bf16.msra.mxu0 %v2819_v22  ;;  %446 = vmatpush1.bf16.msra.mxu1 %v2820_v23  ;;  %v2878_v7 = vld [vmem:[%s4023_s3 + $0x114] ss:$8 sps:$4 sm:$0xff]   ;;  %v2873_v8 = vld [vmem:[%s4023_s3 + $0x10] ss:$8 sps:$4 sm:$0xff]   ;;  %v2881_v10 = vld [vmem:[%s4023_s3 + $0x4] ss:$8 sps:$4 sm:$0xff]  }
  0x6f   :  { %404 = vmatprep.subr.bf16.mxu0 %v2821_v24  ;;  %447 = vmatprep.subr.bf16.mxu1 %v2823_v25  ;;  %v2876_v9 = vld [vmem:[%s4023_s3 + $0x110] ss:$8 sps:$4 sm:$0xff]   ;;  %v2884_v11 = vld [vmem:[%s4023_s3 + $0x104] ss:$8 sps:$4 sm:$0xff]   ;;  %v2879_v12 = vld [vmem:[%s4023_s3] ss:$8 sps:$4 sm:$0xff]  }
  0x70   :  { %v2882_v13 = vld [vmem:[%s4023_s3 + $0x100] ss:$8 sps:$4 sm:$0xff]   ;;  %v2887_v14 = vld [vmem:[%s4023_s3 + $0xf4] ss:$8 sps:$4 sm:$0xff]   ;;  %v2885_v16 = vld [vmem:[%s4023_s3 + $0xf0] ss:$8 sps:$4 sm:$0xff]  }
  0x71   :  { %v2890_v15 = vld [vmem:[%s4023_s3 + $0x1f4] ss:$8 sps:$4 sm:$0xff]   ;;  %v2888_v17 = vld [vmem:[%s4023_s3 + $0x1f0] ss:$8 sps:$4 sm:$0xff]   ;;  %v2893_v18 = vld [vmem:[%s4023_s3 + $0xe4] ss:$8 sps:$4 sm:$0xff]  }
  0x72   :  { %405 = vmatpush1.bf16.msra.mxu0 %v2825_v28  ;;  %448 = vmatpush1.bf16.msra.mxu1 %v2826_v30  ;;  %v2896_v19 = vld [vmem:[%s4023_s3 + $0x1e4] ss:$8 sps:$4 sm:$0xff]   ;;  %v2891_v20 = vld [vmem:[%s4023_s3 + $0xe0] ss:$8 sps:$4 sm:$0xff]   ;;  %v2899_v22 = vld [vmem:[%s4023_s3 + $0xd4] ss:$8 sps:$4 sm:$0xff]  }
  0x73   :  { %406 = vmatprep.subr.bf16.mxu0 %v2827_v31  ;;  %449 = vmatprep.subr.bf16.mxu1 %v2829_v32  ;;  %v2894_v21 = vld [vmem:[%s4023_s3 + $0x1e0] ss:$8 sps:$4 sm:$0xff]   ;;  %v2902_v23 = vld [vmem:[%s4023_s3 + $0x1d4] ss:$8 sps:$4 sm:$0xff]   ;;  %v2897_v24 = vld [vmem:[%s4023_s3 + $0xd0] ss:$8 sps:$4 sm:$0xff]  }
  0x74   :  { %v2900_v25 = vld [vmem:[%s4023_s3 + $0x1d0] ss:$8 sps:$4 sm:$0xff]   ;;  %v2905_v26 = vld [vmem:[%s4023_s3 + $0xc4] ss:$8 sps:$4 sm:$0xff]   ;;  %v2903_v28 = vld [vmem:[%s4023_s3 + $0xc0] ss:$8 sps:$4 sm:$0xff]  }
  0x75   :  { %v2908_v27 = vld [vmem:[%s4023_s3 + $0x1c4] ss:$8 sps:$4 sm:$0xff]   ;;  %v2906_v29 = vld [vmem:[%s4023_s3 + $0x1c0] ss:$8 sps:$4 sm:$0xff]   ;;  %v2911_v30 = vld [vmem:[%s4023_s3 + $0xb4] ss:$8 sps:$4 sm:$0xff]  }
  0x76   :  { %407 = vmatpush1.bf16.msra.mxu0 %v2831_v35  ;;  %450 = vmatpush1.bf16.msra.mxu1 %v2832_v36  ;;  %v2914_v31 = vld [vmem:[%s4023_s3 + $0x1b4] ss:$8 sps:$4 sm:$0xff]   ;;  %v2909_v32 = vld [vmem:[%s4023_s3 + $0xb0] ss:$8 sps:$4 sm:$0xff]   ;;  %v2917_v34 = vld [vmem:[%s4023_s3 + $0xa4] ss:$8 sps:$4 sm:$0xff]  }
  0x77   :  { %2479 = vmatprep.subr.msk.bf16.mxu0 %vm379_vm1, %v2476_v37  ;;  %2481 = vmatprep.subr.msk.bf16.mxu1 %vm379_vm1, %v2478_v38  ;;  %v2912_v33 = vld [vmem:[%s4023_s3 + $0x1b0] ss:$8 sps:$4 sm:$0xff]   ;;  %v2920_v35 = vld [vmem:[%s4023_s3 + $0x1a4] ss:$8 sps:$4 sm:$0xff]   ;;  %v2915_v36 = vld [vmem:[%s4023_s3 + $0xa0] ss:$8 sps:$4 sm:$0xff]  }
  0x78   :  { %v2918_v37 = vld [vmem:[%s4023_s3 + $0x1a0] ss:$8 sps:$4 sm:$0xff]   ;;  %v2923_v38 = vld [vmem:[%s4023_s3 + $0x94] ss:$8 sps:$4 sm:$0xff]   ;;  %v2921_v40 = vld [vmem:[%s4023_s3 + $0x90] ss:$8 sps:$4 sm:$0xff]  }
  0x79   :  { %v2926_v39 = vld [vmem:[%s4023_s3 + $0x194] ss:$8 sps:$4 sm:$0xff]   ;;  %v2924_v41 = vld [vmem:[%s4023_s3 + $0x190] ss:$8 sps:$4 sm:$0xff]   ;;  %v2929_v42 = vld [vmem:[%s4023_s3 + $0x84] ss:$8 sps:$4 sm:$0xff]  }
  0x7a   :  { %423 = vmatpush2.bf16.msra.mxu0 %v381_v44  ;;  %466 = vmatpush2.bf16.msra.mxu1 %v387_v45  ;;  %v2927_v44 = vld [vmem:[%s4023_s3 + $0x80] ss:$8 sps:$4 sm:$0xff]  }
  0x7b   :  { %886 = vmatprep.subr.bf16.mxu0 %v2839_v43  ;;  %929 = vmatprep.subr.bf16.mxu1 %v2842_v46  ;;  %v2932_v43 = vld [vmem:[%s4023_s3 + $0x184] ss:$8 sps:$4 sm:$0xff]   ;;  %v2930_v45 = vld [vmem:[%s4023_s3 + $0x180] ss:$8 sps:$4 sm:$0xff]  }
  0x7c   :  { %v2933_v46 = vld [vmem:[#allocation7 + $0x78] sm:$0xff]  }
  0x7d   :  { %425 = vmatmul.mubr.bf16.vlgmr.msra.gmra.mxu0 %v147_v47  ;;  %468 = vmatmul.mubr.bf16.vlgmr.msra.gmra.mxu1 %v147_v47  ;;  %v185_v47 = vlaneseq }
  0x7e   :  { %887 = vmatpush1.bf16.msra.mxu0 %v2837_v48  ;;  %930 = vmatpush1.bf16.msra.mxu1 %v2840_v49 }
  0x7f   :  { %888 = vmatprep.subr.bf16.mxu0 %v2845_v50  ;;  %931 = vmatprep.subr.bf16.mxu1 %v2848_v51  ;;  %v3777_v48 = vshrl.u32 %v185_v47, 7 }
  0x81   :  { %v3780_v49 = vsub.s32 1, %v3777_v48  ;;  %v199_v50 = vsub.s32 3, %v3777_v48  ;;  %v3784_v51 = vsub.s32 0, %v3777_v48 }
  0x82   :  { %889 = vmatpush1.bf16.msra.mxu0 %v2843_v52  ;;  %932 = vmatpush1.bf16.msra.mxu1 %v2846_v53  ;;  %v195_v52 = vsub.s32 2, %v3777_v48  ;;  %v183_v53 = vld [vmem:[%s4022_s2] sm:$0xf] }
  0x83   :  { %890 = vmatprep.subr.bf16.mxu0 %v2851_v54  ;;  %933 = vmatprep.subr.bf16.mxu1 %v2854_v55 }
  0x86   :  { %891 = vmatpush1.bf16.msra.mxu0 %v2849_v56  ;;  %934 = vmatpush1.bf16.msra.mxu1 %v2852_v57  ;;  %v192_v56 = vrot.slane %v183_v53, %v3780_v49  ;;  %v200_v57 = vrot.slane %v183_v53, %v199_v50 }
  0x87   :  { %892 = vmatprep.subr.bf16.mxu0 %v2857_v58  ;;  %935 = vmatprep.subr.bf16.mxu1 %v2860_v59  ;;  %v188_v58 = vrot.slane %v183_v53, %v3784_v51  ;;  %v196_v59 = vrot.slane %v183_v53, %v195_v52 }
  0x8a   :  { %893 = vmatpush1.bf16.msra.mxu0 %v2855_v60  ;;  %936 = vmatpush1.bf16.msra.mxu1 %v2858_v61 }
  0x8b   :  { %894 = vmatprep.subr.bf16.mxu0 %v2863_v62  ;;  %937 = vmatprep.subr.bf16.mxu1 %v2866_v63 }
  0x8e   :  { %895 = vmatpush1.bf16.msra.mxu0 %v2861_v0  ;;  %938 = vmatpush1.bf16.msra.mxu1 %v2864_v1 }
  0x8f   :  { %896 = vmatprep.subr.bf16.mxu0 %v2869_v2  ;;  %939 = vmatprep.subr.bf16.mxu1 %v2872_v3 }
  0x92   :  { %897 = vmatpush1.bf16.msra.mxu0 %v2867_v4  ;;  %940 = vmatpush1.bf16.msra.mxu1 %v2870_v5 }
  0x93   :  { %898 = vmatprep.subr.bf16.mxu0 %v2875_v6  ;;  %941 = vmatprep.subr.bf16.mxu1 %v2878_v7 }
  0x96   :  { %899 = vmatpush1.bf16.msra.mxu0 %v2873_v8  ;;  %942 = vmatpush1.bf16.msra.mxu1 %v2876_v9 }
  0x97   :  { %900 = vmatprep.subr.bf16.mxu0 %v2881_v10  ;;  %943 = vmatprep.subr.bf16.mxu1 %v2884_v11 }
  0x9a   :  { %901 = vmatpush1.bf16.msra.mxu0 %v2879_v12  ;;  %944 = vmatpush1.bf16.msra.mxu1 %v2882_v13 }
  0x9b   :  { %902 = vmatprep.subr.bf16.mxu0 %v2887_v14  ;;  %945 = vmatprep.subr.bf16.mxu1 %v2890_v15 }
  0x9e   :  { %903 = vmatpush2.bf16.msra.mxu0 %v2885_v16  ;;  %946 = vmatpush2.bf16.msra.mxu1 %v2888_v17 }
  0x9f   :  { %904 = vmatprep.subr.bf16.mxu0 %v2893_v18  ;;  %947 = vmatprep.subr.bf16.mxu1 %v2896_v19 }
  0xa2   :  { %905 = vmatpush2.bf16.msra.mxu0 %v2891_v20  ;;  %948 = vmatpush2.bf16.msra.mxu1 %v2894_v21  ;;  %v2934_v20 = vld [vmem:[#allocation7 + $0x38] sm:$0xff]  }
  0xa3   :  { %906 = vmatprep.subr.bf16.mxu0 %v2899_v22  ;;  %949 = vmatprep.subr.bf16.mxu1 %v2902_v23  ;;  %v2935_v23 = vld [vmem:[#allocation7 + $0x70] sm:$0xff]  }
  0xa6   :  { %907 = vmatpush2.bf16.msra.mxu0 %v2897_v24  ;;  %950 = vmatpush2.bf16.msra.mxu1 %v2900_v25  ;;  %v2936_v24 = vld [vmem:[#allocation7 + $0x30] sm:$0xff]   ;;  %v2937_v25 = vld [vmem:[#allocation7 + $0x68] sm:$0xff]  }
  0xa7   :  { %908 = vmatprep.subr.bf16.mxu0 %v2905_v26  ;;  %951 = vmatprep.subr.bf16.mxu1 %v2908_v27  ;;  %v2938_v26 = vld [vmem:[#allocation7 + $0x28] sm:$0xff]   ;;  %v2939_v27 = vld [vmem:[#allocation7 + $0x60] sm:$0xff]  }
  0xaa   :  { %909 = vmatpush2.bf16.msra.mxu0 %v2903_v28  ;;  %952 = vmatpush2.bf16.msra.mxu1 %v2906_v29  ;;  %v2940_v28 = vld [vmem:[#allocation7 + $0x20] sm:$0xff]   ;;  %v2941_v29 = vld [vmem:[#allocation7 + $0x58] sm:$0xff]  }
  0xab   :  { %910 = vmatprep.subr.bf16.mxu0 %v2911_v30  ;;  %953 = vmatprep.subr.bf16.mxu1 %v2914_v31  ;;  %v2942_v30 = vld [vmem:[#allocation7 + $0x18] sm:$0xff]   ;;  %v2943_v31 = vld [vmem:[#allocation7 + $0x50] sm:$0xff]  }
  0xae   :  { %911 = vmatpush2.bf16.msra.mxu0 %v2909_v32  ;;  %954 = vmatpush2.bf16.msra.mxu1 %v2912_v33  ;;  %v2944_v32 = vld [vmem:[#allocation7 + $0x10] sm:$0xff]   ;;  %v2945_v33 = vld [vmem:[#allocation7 + $0x48] sm:$0xff]  }
  0xaf   :  { %912 = vmatprep.subr.bf16.mxu0 %v2917_v34  ;;  %955 = vmatprep.subr.bf16.mxu1 %v2920_v35  ;;  %v2946_v34 = vld [vmem:[#allocation7 + $0x8] sm:$0xff]   ;;  %v2947_v35 = vld [vmem:[#allocation7 + $0x40] sm:$0xff]  }
  0xb2   :  { %913 = vmatpush2.bf16.msra.mxu0 %v2915_v36  ;;  %956 = vmatpush2.bf16.msra.mxu1 %v2918_v37  ;;  %v2948_v36 = vld [vmem:[#allocation7] sm:$0xff]   ;;  %v2949_v37 = vld [vmem:[#allocation8 + $0x38] sm:$0xff]  }
  0xb3   :  { %914 = vmatprep.subr.bf16.mxu0 %v2923_v38  ;;  %957 = vmatprep.subr.bf16.mxu1 %v2926_v39  ;;  %v3364_v38 = vmov 0.0   ;;  %v2950_v39 = vld [vmem:[#allocation8 + $0x30] sm:$0xff]  }
  0xb6   :  { %915 = vmatpush2.bf16.msra.mxu0 %v2921_v40  ;;  %958 = vmatpush2.bf16.msra.mxu1 %v2924_v41  ;;  %v2951_v40 = vld [vmem:[#allocation8 + $0x28] sm:$0xff]   ;;  %v2952_v41 = vld [vmem:[#allocation8 + $0x20] sm:$0xff]  }
  0xb7   :  { %916 = vmatprep.subr.bf16.mxu0 %v2929_v42  ;;  %959 = vmatprep.subr.bf16.mxu1 %v2932_v43  ;;  %v554_v42 = vld [vmem:[#allocation5] sm:$0x3] }
  0xb8   :  { %v563_v43 = vrot.slane %v554_v42, %v3780_v49 }
  0xba   :  { %917 = vmatpush2.bf16.msra.mxu0 %v2927_v44  ;;  %960 = vmatpush2.bf16.msra.mxu1 %v2930_v45  ;;  %v559_v44 = vrot.slane %v554_v42, %v3784_v51  ;;  %v2983_v42 = vld [vmem:[#allocation13 + $0xe4] ss:$16 sps:$4 sm:$0xff]  }
  0xbb   :  { %2717 = vmatprep.subr.bf16.mxu0 %v2933_v46  ;;  %2748 = vmatprep.subr.bf16.mxu1 %v3364_v38 }
 0x13d   :  { %v426_v54 = vpop.f32.mrf.mxu0  ;;  %v469_v55 = vpop.f32.mrf.mxu1 }
 0x13e   :  { %v427_v4 = vadd.f32 %v426_v54, %v188_v58  ;;  %v470_v5 = vadd.f32 %v469_v55, %v196_v59 }
 0x13f   :  { %v428_v60 = vpop.f32.mrf.mxu0  ;;  %v471_v61 = vpop.f32.mrf.mxu1 }
 0x140   :  { %v429_v0 = vadd.f32 %v428_v60, %v192_v56  ;;  %v472_v1 = vadd.f32 %v471_v61, %v200_v57  ;;  %v478_v16 = vmax.f32 %v427_v4, 0.0  ;;  %v480_v17 = vmax.f32 %v470_v5, 0.0 }
 0x141   :  { %v430_v62 = vpop.f32.mrf.mxu0  ;;  %v473_v63 = vpop.f32.mrf.mxu1 }
 0x142   :  { %v431_v2 = vadd.f32 %v430_v62, %v188_v58  ;;  %v474_v3 = vadd.f32 %v473_v63, %v196_v59  ;;  %v479_v12 = vmax.f32 %v429_v0, 0.0  ;;  %v481_v13 = vmax.f32 %v472_v1, 0.0 }
 0x143   :  { %v432_v6 = vpop.f32.mrf.mxu0  ;;  %v475_v7 = vpop.f32.mrf.mxu1 }
 0x144   :  { %v433_v8 = vadd.f32 %v432_v6, %v192_v56  ;;  %v476_v9 = vadd.f32 %v475_v7, %v200_v57  ;;  %v482_v10 = vmax.f32 %v431_v2, 0.0  ;;  %v484_v11 = vmax.f32 %v474_v3, 0.0 }
 0x146   :  { %v483_v14 = vmax.f32 %v433_v8, 0.0  ;;  %v485_v15 = vmax.f32 %v476_v9, 0.0  ;;  %v486_v21 = vpack.c.bf16 %v482_v10, %v478_v16  ;;  %v488_v22 = vpack.c.bf16 %v484_v11, %v480_v17  ;;  %v2953_v8 = vld [vmem:[#allocation8 + $0x18] sm:$0xff]   ;;  %v2954_v9 = vld [vmem:[#allocation8 + $0x10] sm:$0xff]   ;;  %v2955_v10 = vld [vmem:[#allocation8 + $0x8] sm:$0xff]  }
 0x147   :  { %v2956_v11 = vld [vmem:[#allocation8] sm:$0xff]   ;;  %v2963_v17 = vld [vmem:[#allocation11 + $0x50] ss:$8 sps:$4 sm:$0xff]  }
 0x148   :  { %v487_v18 = vpack.c.bf16 %v483_v14, %v479_v12  ;;  %v489_v19 = vpack.c.bf16 %v485_v15, %v481_v13  ;;  %v2957_v12 = vld [vmem:[#allocation11 + $0x70] ss:$8 sps:$4 sm:$0xff]   ;;  %v2959_v13 = vld [vmem:[#allocation11 + $0x74] ss:$8 sps:$4 sm:$0xff]   ;;  %v2962_v14 = vld [vmem:[#allocation11 + $0x64] ss:$8 sps:$4 sm:$0xff]  }
 0x149   :  { %v2960_v15 = vld [vmem:[#allocation11 + $0x60] ss:$8 sps:$4 sm:$0xff]   ;;  %v2965_v16 = vld [vmem:[#allocation11 + $0x54] ss:$8 sps:$4 sm:$0xff]  }
 0x14a   :  { %918 = vmatprep.mubr.bf16.mxu0 %v487_v18  ;;  %961 = vmatprep.mubr.bf16.mxu1 %v489_v19  ;;  %v2968_v18 = vld [vmem:[#allocation11 + $0x44] ss:$8 sps:$4 sm:$0xff]   ;;  %v2966_v19 = vld [vmem:[#allocation11 + $0x40] ss:$8 sps:$4 sm:$0xff]  }
 0x14b   :  { %919 = vmatmul.mubr.bf16.vlgmr.msra.gmra.mxu0 %v486_v21  ;;  %962 = vmatmul.mubr.bf16.vlgmr.msra.gmra.mxu1 %v488_v22  ;;  %v2969_v21 = vld [vmem:[#allocation11 + $0x30] ss:$8 sps:$4 sm:$0xff]   ;;  %v2974_v22 = vld [vmem:[#allocation11 + $0x24] ss:$8 sps:$4 sm:$0xff]  }
 0x14c   :  { %2718 = vmatpush3.bf16.msra.mxu0 %v2934_v20  ;;  %2749 = vmatpush3.bf16.msra.mxu1 %v2949_v37  ;;  %v2971_v20 = vld [vmem:[#allocation11 + $0x34] ss:$8 sps:$4 sm:$0xff]   ;;  %v2975_v37 = vld [vmem:[#allocation11 + $0x10] ss:$8 sps:$4 sm:$0xff]  }
 0x14d   :  { %2719 = vmatprep.subr.bf16.mxu0 %v2935_v23  ;;  %2750 = vmatprep.subr.bf16.mxu1 %v3364_v38  ;;  %v2972_v23 = vld [vmem:[#allocation11 + $0x20] ss:$8 sps:$4 sm:$0xff]  }
 0x14e   :  { %2764 = vmatprep.mubr.msk.bf16.mxu1 %vm3365_vm2, %v3364_v38 }
 0x150   :  { %2720 = vmatpush3.bf16.msra.mxu0 %v2936_v24  ;;  %2751 = vmatpush3.bf16.msra.mxu1 %v2950_v39  ;;  %v2978_v39 = vld [vmem:[#allocation11] ss:$8 sps:$4 sm:$0xff]  }
 0x151   :  { %2721 = vmatprep.subr.bf16.mxu0 %v2937_v25  ;;  %2752 = vmatprep.subr.bf16.mxu1 %v3364_v38 }
 0x154   :  { %2722 = vmatpush3.bf16.msra.mxu0 %v2938_v26  ;;  %2753 = vmatpush3.bf16.msra.mxu1 %v2951_v40  ;;  %v3366_v40 = vmov 0  }
 0x155   :  { %2723 = vmatprep.subr.bf16.mxu0 %v2939_v27  ;;  %2754 = vmatprep.subr.bf16.mxu1 %v3364_v38  ;;  %v2547_v27 = vld [vmem:[%s4026_s6] ss:$0 sm:$0xff] }
 0x158   :  { %2724 = vmatpush3.bf16.msra.mxu0 %v2940_v28  ;;  %2755 = vmatpush3.bf16.msra.mxu1 %v2952_v41  ;;  %v2981_v41 = vld [vmem:[#allocation13 + $0xe0] ss:$16 sps:$4 sm:$0xff]  }
 0x159   :  { %2725 = vmatprep.subr.bf16.mxu0 %v2941_v29  ;;  %2756 = vmatprep.subr.bf16.mxu1 %v3364_v38 }
 0x15c   :  { %2726 = vmatpush3.bf16.msra.mxu0 %v2942_v30  ;;  %2757 = vmatpush3.bf16.msra.mxu1 %v2953_v8  ;;  %v3053_v8 = vld [vmem:[#allocation13 + $0x160] ss:$16 sps:$4 sm:$0xff]  }
 0x15d   :  { %2727 = vmatprep.subr.bf16.mxu0 %v2943_v31  ;;  %2758 = vmatprep.subr.bf16.mxu1 %v3364_v38 }
 0x160   :  { %2728 = vmatpush3.bf16.msra.mxu0 %v2944_v32  ;;  %2759 = vmatpush3.bf16.msra.mxu1 %v2954_v9  ;;  %v2564_v9 = vld [vmem:[#allocation10] ss:$0 sm:$0xff] }
 0x161   :  { %2729 = vmatprep.subr.bf16.mxu0 %v2945_v33  ;;  %2760 = vmatprep.subr.bf16.mxu1 %v3364_v38 }
 0x164   :  { %2730 = vmatpush3.bf16.msra.mxu0 %v2946_v34  ;;  %2761 = vmatpush3.bf16.msra.mxu1 %v2955_v10 }
 0x165   :  { %2731 = vmatprep.subr.bf16.mxu0 %v2947_v35  ;;  %2762 = vmatprep.subr.bf16.mxu1 %v3364_v38  ;;  %v2980_v38 = vld [vmem:[#allocation11 + $0x4] ss:$8 sps:$4 sm:$0xff]  }
 0x168   :  { %2732 = vmatpush3.bf16.msra.mxu0 %v2948_v36  ;;  %2763 = vmatpush3.bf16.msra.mxu1 %v2956_v11  ;;  %v2977_v36 = vld [vmem:[#allocation11 + $0x14] ss:$8 sps:$4 sm:$0xff]  }
 0x169   :  { %1380 = vmatprep.subr.bf16.mxu0 %v2959_v13  ;;  %1835 = vmatprep.subr.bf16.mxu1 %v2983_v42  ;;  %v3058_v42 = vld [vmem:[#allocation13 + $0x16c] ss:$16 sps:$4 sm:$0xff]  }
 0x20b   :  { %v920_v45 = vpop.f32.mrf.mxu0  ;;  %v963_v46 = vpop.f32.mrf.mxu1 }
 0x20c   :  { %v921_v55 = vadd.f32 %v920_v45, %v559_v44  ;;  %v2987_v45 = vld [vmem:[#allocation13 + $0xc0] ss:$16 sps:$4 sm:$0xff]  }
 0x20d   :  { %v922_v47 = vpop.f32.mrf.mxu0  ;;  %v965_v53 = vpop.f32.mrf.mxu1 }
 0x20e   :  { %v923_v54 = vadd.f32 %v922_v47, %v563_v43  ;;  %v964_v63 = vadd.f32 %v963_v46, %v921_v55  ;;  %v2995_v46 = vld [vmem:[#allocation13 + $0xa4] ss:$16 sps:$4 sm:$0xff]   ;;  %v2993_v47 = vld [vmem:[#allocation13 + $0xa0] ss:$16 sps:$4 sm:$0xff]  }
 0x20f   :  { %v924_v56 = vpop.f32.mrf.mxu0  ;;  %v967_v57 = vpop.f32.mrf.mxu1  ;;  %v3007_v55 = vld [vmem:[#allocation13 + $0x64] ss:$16 sps:$4 sm:$0xff]  }
 0x210   :  { %v925_v58 = vadd.f32 %v924_v56, %v559_v44  ;;  %v966_v60 = vadd.f32 %v965_v53, %v923_v54  ;;  %v972_v5 = vmax.f32 %v964_v63, 0.0  ;;  %v2989_v44 = vld [vmem:[#allocation13 + $0xc4] ss:$16 sps:$4 sm:$0xff]   ;;  %v2999_v54 = vld [vmem:[#allocation13 + $0x80] ss:$16 sps:$4 sm:$0xff]  }
 0x211   :  { %v926_v59 = vpop.f32.mrf.mxu0  ;;  %v969_v0 = vpop.f32.mrf.mxu1  ;;  %v3001_v53 = vld [vmem:[#allocation13 + $0x84] ss:$16 sps:$4 sm:$0xff]   ;;  %v3005_v56 = vld [vmem:[#allocation13 + $0x60] ss:$16 sps:$4 sm:$0xff]  }
 0x212   :  { %v968_v61 = vadd.f32 %v967_v57, %v925_v58  ;;  %v927_v62 = vadd.f32 %v926_v59, %v563_v43  ;;  %v973_v3 = vmax.f32 %v966_v60, 0.0  ;;  %v2986_v43 = vld [vmem:[#allocation13 + $0xec] ss:$16 sps:$4 sm:$0xff]   ;;  %v3013_v57 = vld [vmem:[#allocation13 + $0x44] ss:$16 sps:$4 sm:$0xff]  }
 0x213   :  { %v3011_v58 = vld [vmem:[#allocation13 + $0x40] ss:$16 sps:$4 sm:$0xff]   ;;  %v3019_v59 = vld [vmem:[#allocation13 + $0x24] ss:$16 sps:$4 sm:$0xff]  }
 0x214   :  { %v970_v1 = vadd.f32 %v969_v0, %v927_v62  ;;  %v974_v2 = vmax.f32 %v968_v61, 0.0  ;;  %v3017_v60 = vld [vmem:[#allocation13 + $0x20] ss:$16 sps:$4 sm:$0xff]   ;;  %v3025_v61 = vld [vmem:[#allocation13 + $0x4] ss:$16 sps:$4 sm:$0xff]  }
 0x215   :  { %v3023_v62 = vld [vmem:[#allocation13] ss:$16 sps:$4 sm:$0xff]   ;;  %v3031_v63 = vld [vmem:[#allocation13 + $0x1e4] ss:$16 sps:$4 sm:$0xff]  }
 0x216   :  { %v975_v4 = vmax.f32 %v970_v1, 0.0  ;;  %v976_v7 = vpack.c.bf16 %v974_v2, %v972_v5  ;;  %v3029_v0 = vld [vmem:[#allocation13 + $0x1e0] ss:$16 sps:$4 sm:$0xff]   ;;  %v3037_v1 = vld [vmem:[#allocation13 + $0x1c4] ss:$16 sps:$4 sm:$0xff]  }
 0x217   :  { %v3035_v2 = vld [vmem:[#allocation13 + $0x1c0] ss:$16 sps:$4 sm:$0xff]   ;;  %v3049_v5 = vld [vmem:[#allocation13 + $0x184] ss:$16 sps:$4 sm:$0xff]  }
 0x218   :  { %v977_v6 = vpack.c.bf16 %v975_v4, %v973_v3  ;;  %v3043_v3 = vld [vmem:[#allocation13 + $0x1a4] ss:$16 sps:$4 sm:$0xff]   ;;  %v3041_v4 = vld [vmem:[#allocation13 + $0x1a0] ss:$16 sps:$4 sm:$0xff]  }
 0x21a   :  { %1145 = vmatprep.mubr.bf16.mxu0 %v977_v6  ;;  %v3047_v6 = vld [vmem:[#allocation13 + $0x180] ss:$16 sps:$4 sm:$0xff]  }
 0x21b   :  { %1146 = vmatmul.mubr.bf16.vlgmr.msra.gmra.mxu0 %v976_v7  ;;  %v3055_v7 = vld [vmem:[#allocation13 + $0x164] ss:$16 sps:$4 sm:$0xff]  }
 0x21c   :  { %1381 = vmatpush1.bf16.msra.mxu0 %v2957_v12  ;;  %1412 = vmatprep.mubr.bf16.mxu0 %v3366_v40  ;;  %v3052_v40 = vld [vmem:[#allocation13 + $0x18c] ss:$16 sps:$4 sm:$0xff]  }
 0x21d   :  { %1382 = vmatprep.subr.bf16.mxu0 %v2962_v14 }
 0x220   :  { %1383 = vmatpush1.bf16.msra.mxu0 %v2960_v15 }
 0x221   :  { %1384 = vmatprep.subr.bf16.mxu0 %v2965_v16 }
 0x224   :  { %1385 = vmatpush1.bf16.msra.mxu0 %v2963_v17 }
 0x225   :  { %1386 = vmatprep.subr.bf16.mxu0 %v2968_v18  ;;  %v2984_v18 = vld [vmem:[#allocation13 + $0xe8] ss:$16 sps:$4 sm:$0xff]  }
 0x228   :  { %1387 = vmatpush1.bf16.msra.mxu0 %v2966_v19 }
 0x229   :  { %1388 = vmatprep.subr.bf16.mxu0 %v2971_v20  ;;  %v2992_v20 = vld [vmem:[#allocation13 + $0xcc] ss:$16 sps:$4 sm:$0xff]  }
 0x22c   :  { %1389 = vmatpush1.bf16.msra.mxu0 %v2969_v21  ;;  %v2990_v21 = vld [vmem:[#allocation13 + $0xc8] ss:$16 sps:$4 sm:$0xff]  }
 0x22d   :  { %1390 = vmatprep.subr.bf16.mxu0 %v2974_v22  ;;  %v2998_v22 = vld [vmem:[#allocation13 + $0xac] ss:$16 sps:$4 sm:$0xff]  }
 0x230   :  { %1391 = vmatpush1.bf16.msra.mxu0 %v2972_v23  ;;  %v2996_v23 = vld [vmem:[#allocation13 + $0xa8] ss:$16 sps:$4 sm:$0xff]  }
 0x231   :  { %1392 = vmatprep.subr.bf16.mxu0 %v2977_v36  ;;  %v3040_v36 = vld [vmem:[#allocation13 + $0x1cc] ss:$16 sps:$4 sm:$0xff]  }
 0x234   :  { %1393 = vmatpush1.bf16.msra.mxu0 %v2975_v37  ;;  %v3038_v37 = vld [vmem:[#allocation13 + $0x1c8] ss:$16 sps:$4 sm:$0xff]  }
 0x235   :  { %1394 = vmatprep.subr.bf16.mxu0 %v2980_v38  ;;  %v3046_v38 = vld [vmem:[#allocation13 + $0x1ac] ss:$16 sps:$4 sm:$0xff]  }
 0x238   :  { %1395 = vmatpush1.bf16.msra.mxu0 %v2978_v39  ;;  %v3044_v39 = vld [vmem:[#allocation13 + $0x1a8] ss:$16 sps:$4 sm:$0xff]  }
 0x239   :  { %1878 = vmatprep.subr.bf16.mxu0 %v2986_v43  ;;  %v3056_v43 = vld [vmem:[#allocation13 + $0x168] ss:$16 sps:$4 sm:$0xff]  }
 0x2db   :  { %v2733_v24 = vpop.f32.mrf.mxu0 }
 0x2dd   :  { %v2734_v25 = vpop.f32.mrf.mxu0 }
 0x2de   :  { %v2735_v26 = vadd.f32 %v2734_v25, %v2733_v24  ;;  %v3004_v24 = vld [vmem:[#allocation13 + $0x8c] ss:$16 sps:$4 sm:$0xff]   ;;  %v3002_v25 = vld [vmem:[#allocation13 + $0x88] ss:$16 sps:$4 sm:$0xff]  }
 0x2df   :  { %v2736_v28 = vpop.f32.mrf.mxu0 }
 0x2e0   :  { %v1148_v30 = vadd.f32 %v2735_v26, %v2547_v27  ;;  %v3010_v26 = vld [vmem:[#allocation13 + $0x6c] ss:$16 sps:$4 sm:$0xff]  }
 0x2e1   :  { %v2737_v29 = vpop.f32.mrf.mxu0 }
 0x2e2   :  { %v2738_v31 = vadd.f32 %v2737_v29, %v2736_v28  ;;  %v1154_v33 = vmax.f32 %v1148_v30, 0.0  ;;  %v3016_v28 = vld [vmem:[#allocation13 + $0x4c] ss:$16 sps:$4 sm:$0xff]   ;;  %v3014_v29 = vld [vmem:[#allocation13 + $0x48] ss:$16 sps:$4 sm:$0xff]  }
 0x2e3   :  { %v3022_v30 = vld [vmem:[#allocation13 + $0x2c] ss:$16 sps:$4 sm:$0xff]  }
 0x2e4   :  { %v1151_v32 = vadd.f32 %v2738_v31, %v2547_v27  ;;  %v3008_v27 = vld [vmem:[#allocation13 + $0x68] ss:$16 sps:$4 sm:$0xff]  }
 0x2e5   :  { %v3020_v31 = vld [vmem:[#allocation13 + $0x28] ss:$16 sps:$4 sm:$0xff]  }
 0x2e6   :  { %v1155_v34 = vmax.f32 %v1151_v32, 0.0  ;;  %v3028_v32 = vld [vmem:[#allocation13 + $0xc] ss:$16 sps:$4 sm:$0xff]  }
 0x2e8   :  { %v1156_v35 = vpack.c.bf16 %v1155_v34, %v1154_v33  ;;  %v3026_v33 = vld [vmem:[#allocation13 + $0x8] ss:$16 sps:$4 sm:$0xff]   ;;  %v3034_v34 = vld [vmem:[#allocation13 + $0x1ec] ss:$16 sps:$4 sm:$0xff]  }
 0x2ea   :  { %2765 = vmatmul.mubr.bf16.vlgmr.msra.gmra.mxu1 %v1156_v35  ;;  %v3032_v35 = vld [vmem:[#allocation13 + $0x1e8] ss:$16 sps:$4 sm:$0xff]  }
 0x2eb   :  { %1836 = vmatpush1.bf16.msra.mxu1 %v2981_v41  ;;  %v3050_v41 = vld [vmem:[#allocation13 + $0x188] ss:$16 sps:$4 sm:$0xff]  }
 0x2ec   :  { %1837 = vmatprep.subr.bf16.mxu1 %v2989_v44  ;;  %v3061_v44 = vld [vmem:[#allocation13 + $0x144] ss:$16 sps:$4 sm:$0xff]  }
 0x2ef   :  { %1838 = vmatpush1.bf16.msra.mxu1 %v2987_v45  ;;  %v3064_v45 = vld [vmem:[#allocation13 + $0x14c] ss:$16 sps:$4 sm:$0xff]  }
 0x2f0   :  { %1839 = vmatprep.subr.bf16.mxu1 %v2995_v46  ;;  %v3059_v46 = vld [vmem:[#allocation13 + $0x140] ss:$16 sps:$4 sm:$0xff]  }
 0x2f3   :  { %1840 = vmatpush1.bf16.msra.mxu1 %v2993_v47  ;;  %v3062_v47 = vld [vmem:[#allocation13 + $0x148] ss:$16 sps:$4 sm:$0xff]  }
 0x2f4   :  { %1841 = vmatprep.subr.bf16.mxu1 %v3001_v53  ;;  %v3067_v53 = vld [vmem:[#allocation13 + $0x124] ss:$16 sps:$4 sm:$0xff]  }
 0x2f7   :  { %1842 = vmatpush1.bf16.msra.mxu1 %v2999_v54  ;;  %v3070_v54 = vld [vmem:[#allocation13 + $0x12c] ss:$16 sps:$4 sm:$0xff]  }
 0x2f8   :  { %1843 = vmatprep.subr.bf16.mxu1 %v3007_v55  ;;  %v3065_v55 = vld [vmem:[#allocation13 + $0x120] ss:$16 sps:$4 sm:$0xff]  }
 0x2fb   :  { %1844 = vmatpush1.bf16.msra.mxu1 %v3005_v56  ;;  %v3068_v56 = vld [vmem:[#allocation13 + $0x128] ss:$16 sps:$4 sm:$0xff]  }
 0x2fc   :  { %1845 = vmatprep.subr.bf16.mxu1 %v3013_v57  ;;  %v3073_v57 = vld [vmem:[#allocation13 + $0x104] ss:$16 sps:$4 sm:$0xff]  }
 0x2ff   :  { %1846 = vmatpush1.bf16.msra.mxu1 %v3011_v58  ;;  %v3076_v58 = vld [vmem:[#allocation13 + $0x10c] ss:$16 sps:$4 sm:$0xff]  }
 0x300   :  { %1847 = vmatprep.subr.bf16.mxu1 %v3019_v59  ;;  %v3071_v59 = vld [vmem:[#allocation13 + $0x100] ss:$16 sps:$4 sm:$0xff]  }
 0x303   :  { %1848 = vmatpush1.bf16.msra.mxu1 %v3017_v60  ;;  %v3074_v60 = vld [vmem:[#allocation13 + $0x108] ss:$16 sps:$4 sm:$0xff]  }
 0x304   :  { %1849 = vmatprep.subr.bf16.mxu1 %v3025_v61  ;;  %v3079_v61 = vld [vmem:[%s4033_s13 + $0x74] ss:$8 sps:$4 sm:$0xff]  }
 0x307   :  { %1850 = vmatpush1.bf16.msra.mxu1 %v3023_v62  ;;  %v3082_v62 = vld [vmem:[%s4033_s13 + $0x174] ss:$8 sps:$4 sm:$0xff]  }
 0x308   :  { %1851 = vmatprep.subr.bf16.mxu1 %v3031_v63  ;;  %v1288_v63 = vld [vmem:[%s4030_s10] sm:$0x3] }
 0x30b   :  { %1852 = vmatpush2.bf16.msra.mxu1 %v3029_v0 }
 0x30c   :  { %1853 = vmatprep.subr.bf16.mxu1 %v3037_v1  ;;  %v1297_v1 = vrot.slane %v1288_v63, %v3780_v49 }
 0x30f   :  { %1854 = vmatpush2.bf16.msra.mxu1 %v3035_v2  ;;  %v1293_v2 = vrot.slane %v1288_v63, %v3784_v51  ;;  %v3145_v63 = vld [vmem:[%s4033_s13 + $0xc4] ss:$8 sps:$4 sm:$0xff]  }
 0x310   :  { %1855 = vmatprep.subr.bf16.mxu1 %v3043_v3 }
 0x313   :  { %1856 = vmatpush2.bf16.msra.mxu1 %v3041_v4 }
 0x314   :  { %1857 = vmatprep.subr.bf16.mxu1 %v3049_v5 }
 0x317   :  { %1858 = vmatpush2.bf16.msra.mxu1 %v3047_v6 }
 0x318   :  { %1859 = vmatprep.subr.bf16.mxu1 %v3055_v7 }
 0x31b   :  { %1860 = vmatpush2.bf16.msra.mxu1 %v3053_v8 }
 0x31c   :  { %1861 = vmatprep.subr.bf16.mxu1 %v3061_v44  ;;  %v3119_v44 = vld [vmem:[%s4033_s13] ss:$8 sps:$4 sm:$0xff]  }
 0x31f   :  { %1862 = vmatpush2.bf16.msra.mxu1 %v3059_v46  ;;  %v3127_v46 = vld [vmem:[%s4033_s13 + $0xf4] ss:$8 sps:$4 sm:$0xff]  }
 0x320   :  { %1863 = vmatprep.subr.bf16.mxu1 %v3067_v53  ;;  %v3125_v53 = vld [vmem:[%s4033_s13 + $0xf0] ss:$8 sps:$4 sm:$0xff]  }
 0x323   :  { %1864 = vmatpush2.bf16.msra.mxu1 %v3065_v55  ;;  %v3133_v55 = vld [vmem:[%s4033_s13 + $0xe4] ss:$8 sps:$4 sm:$0xff]  }
 0x324   :  { %1865 = vmatprep.subr.bf16.mxu1 %v3073_v57  ;;  %v3131_v57 = vld [vmem:[%s4033_s13 + $0xe0] ss:$8 sps:$4 sm:$0xff]  }
 0x327   :  { %1866 = vmatpush2.bf16.msra.mxu1 %v3071_v59  ;;  %v3139_v59 = vld [vmem:[%s4033_s13 + $0xd4] ss:$8 sps:$4 sm:$0xff]  }
 0x328   :  { %2329 = vmatprep.subr.bf16.mxu1 %v3079_v61  ;;  %v3137_v61 = vld [vmem:[%s4033_s13 + $0xd0] ss:$8 sps:$4 sm:$0xff]  }
 0x3aa   :  { %v1262_v10 = vpop.f32.mrf.mxu1 }
 0x3ab   :  { %v1263_v12 = vadd.f32 %v2564_v9, %v1262_v10 }
 0x3ac   :  { %v2766_v11 = vpop.f32.mrf.mxu1 }
 0x3ad   :  { %v1269_v16 = vmax.f32 %v1263_v12, 0.0 }
 0x3ae   :  { %v1265_v13 = vpop.f32.mrf.mxu1 }
 0x3af   :  { %v1266_v14 = vadd.f32 %v2564_v9, %v1265_v13 }
 0x3b0   :  { %v2767_v15 = vpop.f32.mrf.mxu1 }
 0x3b1   :  { %v1270_v17 = vmax.f32 %v1266_v14, 0.0  ;;  %v3077_v15 = vld [vmem:[%s4033_s13 + $0x70] ss:$8 sps:$4 sm:$0xff]  }
 0x3b3   :  { %v1271_v19 = vpack.c.bf16 %v1270_v17, %v1269_v16  ;;  %v3080_v16 = vld [vmem:[%s4033_s13 + $0x170] ss:$8 sps:$4 sm:$0xff]  }
 0x3b5   :  { %1413 = vmatmul.mubr.bf16.vlgmr.msra.gmra.mxu0 %v1271_v19  ;;  %v3088_v19 = vld [vmem:[%s4033_s13 + $0x164] ss:$8 sps:$4 sm:$0xff]  }
 0x3b6   :  { %1879 = vmatpush1.bf16.msra.mxu0 %v2984_v18  ;;  %v3085_v18 = vld [vmem:[%s4033_s13 + $0x64] ss:$8 sps:$4 sm:$0xff]  }
 0x3b7   :  { %1880 = vmatprep.subr.bf16.mxu0 %v2992_v20  ;;  %v3083_v20 = vld [vmem:[%s4033_s13 + $0x60] ss:$8 sps:$4 sm:$0xff]  }
 0x3ba   :  { %1881 = vmatpush1.bf16.msra.mxu0 %v2990_v21  ;;  %v3086_v21 = vld [vmem:[%s4033_s13 + $0x160] ss:$8 sps:$4 sm:$0xff]  }
 0x3bb   :  { %1882 = vmatprep.subr.bf16.mxu0 %v2998_v22  ;;  %v3091_v22 = vld [vmem:[%s4033_s13 + $0x54] ss:$8 sps:$4 sm:$0xff]  }
 0x3be   :  { %1883 = vmatpush1.bf16.msra.mxu0 %v2996_v23  ;;  %v3094_v23 = vld [vmem:[%s4033_s13 + $0x154] ss:$8 sps:$4 sm:$0xff]  }
 0x3bf   :  { %1884 = vmatprep.subr.bf16.mxu0 %v3004_v24  ;;  %v3089_v24 = vld [vmem:[%s4033_s13 + $0x50] ss:$8 sps:$4 sm:$0xff]  }
 0x3c2   :  { %1885 = vmatpush1.bf16.msra.mxu0 %v3002_v25  ;;  %v3092_v25 = vld [vmem:[%s4033_s13 + $0x150] ss:$8 sps:$4 sm:$0xff]  }
 0x3c3   :  { %1886 = vmatprep.subr.bf16.mxu0 %v3010_v26  ;;  %v3097_v26 = vld [vmem:[%s4033_s13 + $0x44] ss:$8 sps:$4 sm:$0xff]  }
 0x3c6   :  { %1887 = vmatpush1.bf16.msra.mxu0 %v3008_v27  ;;  %v3100_v27 = vld [vmem:[%s4033_s13 + $0x144] ss:$8 sps:$4 sm:$0xff]  }
 0x3c7   :  { %1888 = vmatprep.subr.bf16.mxu0 %v3016_v28  ;;  %v3095_v28 = vld [vmem:[%s4033_s13 + $0x40] ss:$8 sps:$4 sm:$0xff]  }
 0x3ca   :  { %1889 = vmatpush1.bf16.msra.mxu0 %v3014_v29  ;;  %v3098_v29 = vld [vmem:[%s4033_s13 + $0x140] ss:$8 sps:$4 sm:$0xff]  }
 0x3cb   :  { %1890 = vmatprep.subr.bf16.mxu0 %v3022_v30  ;;  %v3103_v30 = vld [vmem:[%s4033_s13 + $0x34] ss:$8 sps:$4 sm:$0xff]  }
 0x3ce   :  { %1891 = vmatpush1.bf16.msra.mxu0 %v3020_v31  ;;  %v3106_v31 = vld [vmem:[%s4033_s13 + $0x134] ss:$8 sps:$4 sm:$0xff]  }
 0x3cf   :  { %1892 = vmatprep.subr.bf16.mxu0 %v3028_v32  ;;  %v3101_v32 = vld [vmem:[%s4033_s13 + $0x30] ss:$8 sps:$4 sm:$0xff]  }
 0x3d2   :  { %1893 = vmatpush1.bf16.msra.mxu0 %v3026_v33  ;;  %v3104_v33 = vld [vmem:[%s4033_s13 + $0x130] ss:$8 sps:$4 sm:$0xff]  }
 0x3d3   :  { %1894 = vmatprep.subr.bf16.mxu0 %v3034_v34  ;;  %v3109_v34 = vld [vmem:[%s4033_s13 + $0x24] ss:$8 sps:$4 sm:$0xff]  }
 0x3d6   :  { %1895 = vmatpush2.bf16.msra.mxu0 %v3032_v35  ;;  %v3112_v35 = vld [vmem:[%s4033_s13 + $0x124] ss:$8 sps:$4 sm:$0xff]  }
 0x3d7   :  { %1896 = vmatprep.subr.bf16.mxu0 %v3040_v36  ;;  %v3107_v36 = vld [vmem:[%s4033_s13 + $0x20] ss:$8 sps:$4 sm:$0xff]  }
 0x3da   :  { %1897 = vmatpush2.bf16.msra.mxu0 %v3038_v37  ;;  %v3110_v37 = vld [vmem:[%s4033_s13 + $0x120] ss:$8 sps:$4 sm:$0xff]  }
 0x3db   :  { %1898 = vmatprep.subr.bf16.mxu0 %v3046_v38  ;;  %v3115_v38 = vld [vmem:[%s4033_s13 + $0x14] ss:$8 sps:$4 sm:$0xff]  }
 0x3de   :  { %1899 = vmatpush2.bf16.msra.mxu0 %v3044_v39  ;;  %v3118_v39 = vld [vmem:[%s4033_s13 + $0x114] ss:$8 sps:$4 sm:$0xff]  }
 0x3df   :  { %1900 = vmatprep.subr.bf16.mxu0 %v3052_v40  ;;  %v3113_v40 = vld [vmem:[%s4033_s13 + $0x10] ss:$8 sps:$4 sm:$0xff]  }
 0x3e2   :  { %1901 = vmatpush2.bf16.msra.mxu0 %v3050_v41  ;;  %v3116_v41 = vld [vmem:[%s4033_s13 + $0x110] ss:$8 sps:$4 sm:$0xff]  }
 0x3e3   :  { %1902 = vmatprep.subr.bf16.mxu0 %v3058_v42  ;;  %v3121_v42 = vld [vmem:[%s4033_s13 + $0x4] ss:$8 sps:$4 sm:$0xff]  }
 0x3e6   :  { %1903 = vmatpush2.bf16.msra.mxu0 %v3056_v43  ;;  %v3124_v43 = vld [vmem:[%s4033_s13 + $0x104] ss:$8 sps:$4 sm:$0xff]  }
 0x3e7   :  { %1904 = vmatprep.subr.bf16.mxu0 %v3064_v45  ;;  %v3122_v45 = vld [vmem:[%s4033_s13 + $0x100] ss:$8 sps:$4 sm:$0xff]  }
 0x3ea   :  { %1905 = vmatpush2.bf16.msra.mxu0 %v3062_v47  ;;  %v3130_v47 = vld [vmem:[%s4033_s13 + $0x1f4] ss:$8 sps:$4 sm:$0xff]  }
 0x3eb   :  { %1906 = vmatprep.subr.bf16.mxu0 %v3070_v54  ;;  %v3128_v54 = vld [vmem:[%s4033_s13 + $0x1f0] ss:$8 sps:$4 sm:$0xff]  }
 0x3ee   :  { %1907 = vmatpush2.bf16.msra.mxu0 %v3068_v56  ;;  %v3136_v56 = vld [vmem:[%s4033_s13 + $0x1e4] ss:$8 sps:$4 sm:$0xff]  }
 0x3ef   :  { %1908 = vmatprep.subr.bf16.mxu0 %v3076_v58  ;;  %v3134_v58 = vld [vmem:[%s4033_s13 + $0x1e0] ss:$8 sps:$4 sm:$0xff]  }
 0x3f2   :  { %1909 = vmatpush2.bf16.msra.mxu0 %v3074_v60  ;;  %v3142_v60 = vld [vmem:[%s4033_s13 + $0x1d4] ss:$8 sps:$4 sm:$0xff]  }
 0x3f3   :  { %2372 = vmatprep.subr.bf16.mxu0 %v3082_v62  ;;  %v3140_v62 = vld [vmem:[%s4033_s13 + $0x1d0] ss:$8 sps:$4 sm:$0xff]  }
 0x475   :  { %v1414_v0 = vpop.f32.mrf.mxu0 }
 0x476   :  { %v1415_v7 = vadd.f32 %v1414_v0, %v1293_v2  ;;  %v3148_v0 = vld [vmem:[%s4033_s13 + $0x1c4] ss:$8 sps:$4 sm:$0xff]  }
 0x477   :  { %v1416_v3 = vpop.f32.mrf.mxu0 }
 0x478   :  { %v1417_v5 = vadd.f32 %v1416_v3, %v1297_v1  ;;  %v1423_v13 = vmax.f32 %v1415_v7, 0.0  ;;  %v3151_v3 = vld [vmem:[%s4033_s13 + $0xb4] ss:$8 sps:$4 sm:$0xff]   ;;  %v3157_v7 = vld [vmem:[%s4033_s13 + $0xa4] ss:$8 sps:$4 sm:$0xff]  }
 0x479   :  { %v1418_v4 = vpop.f32.mrf.mxu0 }
 0x47a   :  { %v1419_v6 = vadd.f32 %v1418_v4, %v1293_v2  ;;  %v1424_v11 = vmax.f32 %v1417_v5, 0.0  ;;  %v3146_v2 = vld [vmem:[%s4033_s13 + $0x1c0] ss:$8 sps:$4 sm:$0xff]   ;;  %v3154_v4 = vld [vmem:[%s4033_s13 + $0x1b4] ss:$8 sps:$4 sm:$0xff]  }
 0x47b   :  { %v1420_v8 = vpop.f32.mrf.mxu0  ;;  %v3149_v5 = vld [vmem:[%s4033_s13 + $0xb0] ss:$8 sps:$4 sm:$0xff]  }
 0x47c   :  { %v1421_v9 = vadd.f32 %v1420_v8, %v1297_v1  ;;  %v1425_v10 = vmax.f32 %v1419_v6, 0.0  ;;  %v3143_v1 = vld [vmem:[%s4033_s13 + $0xc0] ss:$8 sps:$4 sm:$0xff]   ;;  %v3152_v6 = vld [vmem:[%s4033_s13 + $0x1b0] ss:$8 sps:$4 sm:$0xff]  }
 0x47d   :  { %v3160_v8 = vld [vmem:[%s4033_s13 + $0x1a4] ss:$8 sps:$4 sm:$0xff]  }
 0x47e   :  { %v1426_v12 = vmax.f32 %v1421_v9, 0.0  ;;  %v1427_v17 = vpack.c.bf16 %v1425_v10, %v1423_v13  ;;  %v3155_v9 = vld [vmem:[%s4033_s13 + $0xa0] ss:$8 sps:$4 sm:$0xff]   ;;  %v3161_v13 = vld [vmem:[%s4033_s13 + $0x90] ss:$8 sps:$4 sm:$0xff]  }
 0x47f   :  { %v3158_v10 = vld [vmem:[%s4033_s13 + $0x1a0] ss:$8 sps:$4 sm:$0xff]  }
 0x480   :  { %v1428_v14 = vpack.c.bf16 %v1426_v12, %v1424_v11  ;;  %v3163_v11 = vld [vmem:[%s4033_s13 + $0x94] ss:$8 sps:$4 sm:$0xff]  }
 0x481   :  { %v3166_v12 = vld [vmem:[%s4033_s13 + $0x194] ss:$8 sps:$4 sm:$0xff]  }
 0x482   :  { %1867 = vmatprep.mubr.bf16.mxu1 %v1428_v14  ;;  %1910 = vmatprep.mubr.bf16.mxu0 %v1428_v14  ;;  %v3164_v14 = vld [vmem:[%s4033_s13 + $0x190] ss:$8 sps:$4 sm:$0xff]  }
 0x483   :  { %1868 = vmatmul.mubr.bf16.vlgmr.msra.gmra.mxu1 %v1427_v17  ;;  %1911 = vmatmul.mubr.bf16.vlgmr.msra.gmra.mxu0 %v1427_v17  ;;  %v3167_v17 = vld [vmem:[%s4033_s13 + $0x80] ss:$8 sps:$4 sm:$0xff]  }
 0x484   :  { %2330 = vmatpush1.bf16.msra.mxu1 %v3077_v15  ;;  %2373 = vmatpush1.bf16.msra.mxu0 %v3080_v16  ;;  %v3169_v15 = vld [vmem:[%s4033_s13 + $0x84] ss:$8 sps:$4 sm:$0xff]  }
 0x485   :  { %2331 = vmatprep.subr.bf16.mxu1 %v3085_v18  ;;  %2374 = vmatprep.subr.bf16.mxu0 %v3088_v19  ;;  %v3172_v16 = vld [vmem:[%s4033_s13 + $0x184] ss:$8 sps:$4 sm:$0xff]   ;;  %v3170_v18 = vld [vmem:[%s4033_s13 + $0x180] ss:$8 sps:$4 sm:$0xff]  }
 0x486   :  { %v1493_v19 = vld [vmem:[%s4032_s12] sm:$0xf] }
 0x488   :  { %2332 = vmatpush1.bf16.msra.mxu1 %v3083_v20  ;;  %2375 = vmatpush1.bf16.msra.mxu0 %v3086_v21 }
 0x489   :  { %2333 = vmatprep.subr.bf16.mxu1 %v3091_v22  ;;  %2376 = vmatprep.subr.bf16.mxu0 %v3094_v23  ;;  %v1502_v22 = vrot.slane %v1493_v19, %v3780_v49  ;;  %v1510_v23 = vrot.slane %v1493_v19, %v199_v50 }
 0x48c   :  { %2334 = vmatpush1.bf16.msra.mxu1 %v3089_v24  ;;  %2377 = vmatpush1.bf16.msra.mxu0 %v3092_v25  ;;  %v1498_v24 = vrot.slane %v1493_v19, %v3784_v51  ;;  %v1506_v25 = vrot.slane %v1493_v19, %v195_v52 }
 0x48d   :  { %2335 = vmatprep.subr.bf16.mxu1 %v3097_v26  ;;  %2378 = vmatprep.subr.bf16.mxu0 %v3100_v27 }
 0x490   :  { %2336 = vmatpush1.bf16.msra.mxu1 %v3095_v28  ;;  %2379 = vmatpush1.bf16.msra.mxu0 %v3098_v29 }
 0x491   :  { %2337 = vmatprep.subr.bf16.mxu1 %v3103_v30  ;;  %2380 = vmatprep.subr.bf16.mxu0 %v3106_v31 }
 0x494   :  { %2338 = vmatpush1.bf16.msra.mxu1 %v3101_v32  ;;  %2381 = vmatpush1.bf16.msra.mxu0 %v3104_v33 }
 0x495   :  { %2339 = vmatprep.subr.bf16.mxu1 %v3109_v34  ;;  %2382 = vmatprep.subr.bf16.mxu0 %v3112_v35 }
 0x498   :  { %2340 = vmatpush1.bf16.msra.mxu1 %v3107_v36  ;;  %2383 = vmatpush1.bf16.msra.mxu0 %v3110_v37 }
 0x499   :  { %2341 = vmatprep.subr.bf16.mxu1 %v3115_v38  ;;  %2384 = vmatprep.subr.bf16.mxu0 %v3118_v39 }
 0x49c   :  { %2342 = vmatpush1.bf16.msra.mxu1 %v3113_v40  ;;  %2385 = vmatpush1.bf16.msra.mxu0 %v3116_v41 }
 0x49d   :  { %2343 = vmatprep.subr.bf16.mxu1 %v3121_v42  ;;  %2386 = vmatprep.subr.bf16.mxu0 %v3124_v43 }
 0x4a0   :  { %2344 = vmatpush1.bf16.msra.mxu1 %v3119_v44  ;;  %2387 = vmatpush1.bf16.msra.mxu0 %v3122_v45 }
 0x4a1   :  { %2345 = vmatprep.subr.bf16.mxu1 %v3127_v46  ;;  %2388 = vmatprep.subr.bf16.mxu0 %v3130_v47 }
 0x4a4   :  { %2346 = vmatpush2.bf16.msra.mxu1 %v3125_v53  ;;  %2389 = vmatpush2.bf16.msra.mxu0 %v3128_v54  ;;  %v1997_v54 = vld [vmem:[%s4034_s14] sm:$0x3]  ;;  %s3367_s14 = smov [#allocation14]  }
 0x4a5   :  { %2347 = vmatprep.subr.bf16.mxu1 %v3133_v55  ;;  %2390 = vmatprep.subr.bf16.mxu0 %v3136_v56  ;;  %v2002_v55 = vrot.slane %v1997_v54, %v3784_v51  ;;  %v2006_v56 = vrot.slane %v1997_v54, %v3780_v49  ;;  %s2428_s25 = sshll.u32 %s3367_s14, 4  ;;  %s2429_s25 = int_to_ptr.vmem [resolvable:$true] %s2428_s25 }
 0x4a6   :  { %s3321_s10 = scalar_lea.vmem %s2429_s25, 512  ;;  %p3326_p8 = scmp.lt.s32.totalorder %s2429_s25, %s2429_s25 }
 0x4a7   :  { %p3322_p7 = scmp.ne.s32.totalorder %s2429_s25, %s3321_s10  ;;  %p3327_p9 = scmp.lt.s32.totalorder %s3321_s10, %s3321_s10 }
 0x4a8   :  { %2348 = vmatpush2.bf16.msra.mxu1 %v3131_v57  ;;  %2391 = vmatpush2.bf16.msra.mxu0 %v3134_v58 }
 0x4a9   :  { %2349 = vmatprep.subr.bf16.mxu1 %v3139_v59  ;;  %2392 = vmatprep.subr.bf16.mxu0 %v3142_v60  ;;  %p3328_p10 = por %p3327_p9, %p3326_p8 }
 0x4ab   :  { %p3329_p11 = pnand %p3328_p10, %p3322_p7 }
 0x4ac   :  { %2350 = vmatpush2.bf16.msra.mxu1 %v3137_v61  ;;  %2393 = vmatpush2.bf16.msra.mxu0 %v3140_v62 }
 0x4ad   :  { %2351 = vmatprep.subr.bf16.mxu1 %v3145_v63  ;;  %2394 = vmatprep.subr.bf16.mxu0 %v3148_v0 }
 0x4b0   :  { %2352 = vmatpush2.bf16.msra.mxu1 %v3143_v1  ;;  %2395 = vmatpush2.bf16.msra.mxu0 %v3146_v2 }
 0x4b1   :  { %2353 = vmatprep.subr.bf16.mxu1 %v3151_v3  ;;  %2396 = vmatprep.subr.bf16.mxu0 %v3154_v4 }
 0x4b4   :  { %2354 = vmatpush2.bf16.msra.mxu1 %v3149_v5  ;;  %2397 = vmatpush2.bf16.msra.mxu0 %v3152_v6 }
 0x4b5   :  { %2355 = vmatprep.subr.bf16.mxu1 %v3157_v7  ;;  %2398 = vmatprep.subr.bf16.mxu0 %v3160_v8 }
 0x4b8   :  { %2356 = vmatpush2.bf16.msra.mxu1 %v3155_v9  ;;  %2399 = vmatpush2.bf16.msra.mxu0 %v3158_v10 }
 0x4b9   :  { %2357 = vmatprep.subr.bf16.mxu1 %v3163_v11  ;;  %2400 = vmatprep.subr.bf16.mxu0 %v3166_v12 }
 0x4bc   :  { %2358 = vmatpush2.bf16.msra.mxu1 %v3161_v13  ;;  %2401 = vmatpush2.bf16.msra.mxu0 %v3164_v14 }
 0x4bd   :  { %2359 = vmatprep.subr.bf16.mxu1 %v3169_v15  ;;  %2402 = vmatprep.subr.bf16.mxu0 %v3172_v16 }
 0x4c0   :  { %2360 = vmatpush2.bf16.msra.mxu1 %v3167_v17  ;;  %2403 = vmatpush2.bf16.msra.mxu0 %v3170_v18 }
 0x543   :  { %v1869_v20 = vpop.f32.mrf.mxu1  ;;  %v1912_v21 = vpop.f32.mrf.mxu0 }
 0x544   :  { %v1870_v34 = vadd.f32 %v1869_v20, %v1498_v24  ;;  %v1913_v35 = vadd.f32 %v1912_v21, %v1506_v25 }
 0x545   :  { %v1871_v26 = vpop.f32.mrf.mxu1  ;;  %v1914_v27 = vpop.f32.mrf.mxu0 }
 0x546   :  { %v1872_v30 = vadd.f32 %v1871_v26, %v1502_v22  ;;  %v1915_v31 = vadd.f32 %v1914_v27, %v1510_v23  ;;  %v1921_v43 = vmax.f32 %v1870_v34, 0.0  ;;  %v1923_v44 = vmax.f32 %v1913_v35, 0.0 }
 0x547   :  { %v1873_v28 = vpop.f32.mrf.mxu1  ;;  %v1916_v29 = vpop.f32.mrf.mxu0 }
 0x548   :  { %v1874_v32 = vadd.f32 %v1873_v28, %v1498_v24  ;;  %v1917_v33 = vadd.f32 %v1916_v29, %v1506_v25  ;;  %v1922_v41 = vmax.f32 %v1872_v30, 0.0  ;;  %v1924_v42 = vmax.f32 %v1915_v31, 0.0 }
 0x549   :  { %v1875_v36 = vpop.f32.mrf.mxu1  ;;  %v1918_v37 = vpop.f32.mrf.mxu0 }
 0x54a   :  { %v1876_v38 = vadd.f32 %v1875_v36, %v1502_v22  ;;  %v1919_v39 = vadd.f32 %v1918_v37, %v1510_v23  ;;  %v1925_v50 = vmax.f32 %v1874_v32, 0.0  ;;  %v1927_v40 = vmax.f32 %v1917_v33, 0.0 }
 0x54c   :  { %v1926_v48 = vmax.f32 %v1876_v38, 0.0  ;;  %v1928_v52 = vmax.f32 %v1919_v39, 0.0  ;;  %v1929_v47 = vpack.c.bf16 %v1925_v50, %v1921_v43  ;;  %v1931_v53 = vpack.c.bf16 %v1927_v40, %v1923_v44 }
 0x54e   :  { %v1930_v45 = vpack.c.bf16 %v1926_v48, %v1922_v41  ;;  %v1932_v46 = vpack.c.bf16 %v1928_v52, %v1924_v42 }
 0x550   :  { %2361 = vmatprep.mubr.bf16.mxu1 %v1930_v45  ;;  %2404 = vmatprep.mubr.bf16.mxu0 %v1932_v46 }
 0x551   :  { %2362 = vmatmul.mubr.bf16.vlgmr.msra.gmra.mxu1 %v1929_v47  ;;  %2405 = vmatmul.mubr.bf16.vlgmr.msra.gmra.mxu0 %v1931_v53 }
 0x611   :  { %v2363_v57 = vpop.f32.mrf.mxu1  ;;  %v2406_v58 = vpop.f32.mrf.mxu0 }
 0x612   :  { %v2364_v59 = vadd.f32 %v2363_v57, %v2002_v55 }
 0x613   :  { %v2365_v60 = vpop.f32.mrf.mxu1  ;;  %v2408_v61 = vpop.f32.mrf.mxu0 }
 0x614   :  { %v2407_v62 = vadd.f32 %v2406_v58, %v2364_v59  ;;  %v2366_v63 = vadd.f32 %v2365_v60, %v2006_v56 }
 0x615   :  { %v2367_v0 = vpop.f32.mrf.mxu1  ;;  %v2410_v1 = vpop.f32.mrf.mxu0 }
 0x616   :  { %3173 = vtanh.f32 %v2407_v62  ;;  %v2409_v2 = vadd.f32 %v2408_v61, %v2366_v63  ;;  %v2368_v3 = vadd.f32 %v2367_v0, %v2002_v55 }
 0x617   :  { %v2369_v4 = vpop.f32.mrf.mxu1  ;;  %v2412_v7 = vpop.f32.mrf.mxu0 }
 0x618   :  { %3175 = vtanh.f32 %v2409_v2  ;;  %v2411_v5 = vadd.f32 %v2410_v1, %v2368_v3  ;;  %v2370_v6 = vadd.f32 %v2369_v4, %v2006_v56 }
 0x61a   :  { %3177 = vtanh.f32 %v2411_v5  ;;  %v2413_v51 = vadd.f32 %v2412_v7, %v2370_v6 }
 0x61c   :  { %3179 = vtanh.f32 %v2413_v51 }
 0x623   :  { %v3174_v49 = vpop.eup %3173 }
 0x624   :  { %2419 = vst [vmem:[#allocation14] sm:$0xff] %v3174_v49 }
 0x625   :  { %v3176_v8 = vpop.eup %3175 }
 0x626   :  { %2420 = vst.msk [vmem:[#allocation14 + $0x8] sm:$0xff] %vm375_vm0, %v3176_v8 }
 0x627   :  { %v3178_v9 = vpop.eup %3177 }
 0x628   :  { %2421 = vst [vmem:[#allocation14 + $0x10] sm:$0xff] %v3178_v9 }
 0x629   :  { %v3180_v10 = vpop.eup %3179 }
 0x62a   :  { %2422 = vst.msk [vmem:[#allocation14 + $0x18] sm:$0xff] %vm375_vm0, %v3180_v10 }
 0x62b   :  { %3332 = shalt.err (!%p3329_p11)
}
 0x62c   :  { %2434 = dma.vmem_to_hbm [thread:$0]  %s2429_s25, 512, %s4035_s15, [#allocation4], %s3359_s7, %s3359_s7, %s3360_s24  }
 0x62d   :  { %3349 = dma.done.wait [#allocation4], 512  }
 0x62e   :  { %3350 = vsyncadd [#allocation4], 4294966784 }
 0x62f   :  { %2438 = vsyncpa [#allocation3], 1 }
 0x630   :  { %2439 = vsyncpa [#allocation6], 1 }
 0x631   :  { %2440 = vsyncpa [#allocation9], 1 }
 0x632   :  { %2441 = vsyncpa [#allocation12], 1 }
 0x633   :  { %2442 = vsyncpa [#allocation4], 1 }

</bundles_post_ra>
